<compile_context>
chip_gen: v6e
topology: v6e:2x2x1
jax: 0.10.0
libtpu: 0.0.40
codegen_flags: <defaults>
</compile_context>

<pallas_src>
import functools

import jax
import jax.numpy as jnp
from jax.experimental import pallas as pl
from jax.experimental.pallas import tpu as pltpu

LANE = 128  # TPU lane width; all channel dims are zero-padded to this.


def _hardswish(x):
    return x * jnp.clip(x + 3.0, 0.0, 6.0) * (1.0 / 6.0)


def _hardsigmoid(x):
    return jnp.clip(x + 3.0, 0.0, 6.0) * (1.0 / 6.0)


# ----------------------------- fused Pallas kernel -----------------------------

def _mobilenet_fused_kernel(xcol_ref, wmat_ref, wdwm_ref, b_ref, o_ref,
                            *, B, HW, Wo):
    """One grid step == B batch elements: im2col patches -> classifier logits."""
    f32 = jnp.float32
    BHW = B * HW

    # --- stem: 3x3 stride-2 conv as one MXU matmul (+ folded BN) + hardswish ---
    xcol = xcol_ref[...].reshape(BHW, LANE)             # bf16 im2col patches
    stem = jnp.dot(xcol, wmat_ref[0], preferred_element_type=f32)
    stem = _hardswish(stem + b_ref[0])                  # (BHW, 128) f32

    # --- expanded_conv: expand 1x1 (+BN) + relu --------------------------------
    y = jnp.dot(stem.astype(jnp.bfloat16), wmat_ref[1],
                preferred_element_type=f32)
    y = jnp.maximum(y + b_ref[1], 0.0)                  # (BHW, 128)

    # --- depthwise 3x3 stride-1 (+BN) + relu -----------------------------------
    # Each tap = XLU roll of the flattened (BHW, 128) tile; spatial boundary
    # masks (and per-image isolation within the batch tile) are pre-folded into
    # the per-tap depthwise weights wdwm, so each tap is one roll + one FMA.
    dacc = y * wdwm_ref[4]                              # center tap, no roll
    for dy in range(3):
        for dx in range(3):
            t = dy * 3 + dx
            if t == 4:
                continue
            s = (dy - 1) * Wo + (dx - 1)
            tap = pltpu.roll(y, (BHW - s) % BHW, axis=0)
            dacc = dacc + tap * wdwm_ref[t]
    d = jnp.maximum(dacc + b_ref[2], 0.0)               # (BHW, 128)

    # --- squeeze-excite: per-image GAP -> FC+relu -> FC+hardsigmoid -> scale ---
    d3 = d.reshape(B, HW, LANE)
    g = jnp.mean(d3, axis=1)                            # (B, 128)
    g = jnp.dot(g.astype(jnp.bfloat16), wmat_ref[2], preferred_element_type=f32)
    g = jnp.maximum(g + b_ref[3], 0.0)
    g = jnp.dot(g.astype(jnp.bfloat16), wmat_ref[3], preferred_element_type=f32)
    # Padded lanes get a hardsigmoid(0)=0.5 gate but multiply zero activations,
    # so outputs stay exactly zero there (benign).
    g = _hardsigmoid(g + b_ref[4])
    d = (d3 * g[:, None, :]).reshape(BHW, LANE)

    # --- project 1x1 (+BN, no act) + residual add ------------------------------
    p = jnp.dot(d.astype(jnp.bfloat16), wmat_ref[4], preferred_element_type=f32)
    p = p + b_ref[5] + stem

    # --- head 1x1 conv (+BN) + hardswish ---------------------------------------
    h = jnp.dot(p.astype(jnp.bfloat16), wmat_ref[5], preferred_element_type=f32)
    h = _hardswish(h + b_ref[6])

    # --- AdaptiveAvgPool2d((1,1)) + classifier Conv2d 1x1 (with bias) ----------
    v = jnp.mean(h.reshape(B, HW, LANE), axis=1)        # (B, 128)
    logits = jnp.dot(v.astype(jnp.bfloat16), wmat_ref[6],
                     preferred_element_type=f32)
    o_ref[0] = logits + b_ref[7]                        # (B, 128), lane dense


def _pick_batch_tile(N):
    """Images per grid step. Prefer large B (fills the 256-wide MXU: B*HW>=256)
    while keeping >=2 grid steps so the batch axis can split over v7x's 2 TCs."""
    for B in (8, 4, 2, 1):
        if N % B == 0 and N // B >= 2:
            return B
    return N  # tiny batch: single grid step


def _mobilenet_pallas(xcol, wmat, wdwm, biases, *, B, HW, Wo):
    N = xcol.shape[0]
    assert N % B == 0
    G = N // B
    kern = functools.partial(_mobilenet_fused_kernel, B=B, HW=HW, Wo=Wo)
    out = pl.pallas_call(
        kern,
        grid=(G,),
        in_specs=[
            # Dense (HW,128) tiles, one contiguous DMA per batch tile.
            pl.BlockSpec((B, HW, LANE), lambda n: (n, 0, 0)),
            # Weights / masks / biases: constant index maps -> stay VMEM resident.
            pl.BlockSpec((7, LANE, LANE), lambda n: (0, 0, 0)),
            pl.BlockSpec((9, B * HW, LANE), lambda n: (0, 0, 0)),
            pl.BlockSpec((8, LANE), lambda n: (0, 0)),
        ],
        out_specs=pl.BlockSpec((1, B, LANE), lambda n: (n, 0, 0)),
        out_shape=jax.ShapeDtypeStruct((G, B, LANE), jnp.float32),
        compiler_params=pltpu.CompilerParams(
            dimension_semantics=("parallel",)),
    )(xcol, wmat, wdwm, biases)
    return out.reshape(N, LANE)


# ----------------------------- parameter handling ---------------------------

def _bn_fold(key, c, eps=1e-3):
    """Deterministic eval-mode BatchNorm folded into (scale, bias)."""
    k1, k2, k3, k4 = jax.random.split(key, 4)
    gamma = 1.0 + 0.1 * jax.random.normal(k1, (c,), jnp.float32)
    beta = 0.1 * jax.random.normal(k2, (c,), jnp.float32)
    mean = 0.1 * jax.random.normal(k3, (c,), jnp.float32)
    var = 1.0 + 0.1 * jnp.abs(jax.random.normal(k4, (c,), jnp.float32))
    scale = gamma / jnp.sqrt(var + eps)
    bias = beta - mean * scale
    return scale, bias


def init_mobilenet_params(key, in_ch=4, num_classes=10, multiplier=1.0):
    """Small MobileNetV3-style conv_defs spec, depth-multiplied, initialized
    deterministically (mirrors the constructor's parameter shapes)."""
    if multiplier <= 0:
        raise ValueError("`multiplier` is not greater than zero.")
    depth = lambda c: max(int(round(c * multiplier)), 1)
    c_stem, c_exp, c_se, c_last = depth(8), depth(16), depth(8), depth(32)
    ks = jax.random.split(key, 16)
    nrm = lambda k, s: 0.1 * jax.random.normal(k, s, jnp.float32)
    p = {
        # stem: Conv2d 3x3 stride 2 + BN + hardswish
        "stem_w": nrm(ks[0], (3, 3, in_ch, c_stem)),
        "stem_bn": _bn_fold(ks[1], c_stem),
        # expanded_conv block (expand -> dw -> SE -> project, residual)
        "exp_w": nrm(ks[2], (c_stem, c_exp)),
        "exp_bn": _bn_fold(ks[3], c_exp),
        "dw_w": nrm(ks[4], (3, 3, c_exp)),
        "dw_bn": _bn_fold(ks[5], c_exp),
        "se_w1": nrm(ks[6], (c_exp, c_se)),
        "se_b1": 0.01 * jax.random.normal(ks[7], (c_se,), jnp.float32),
        "se_w2": nrm(ks[8], (c_se, c_exp)),
        "se_b2": 0.01 * jax.random.normal(ks[9], (c_exp,), jnp.float32),
        "proj_w": nrm(ks[10], (c_exp, c_stem)),
        "proj_bn": _bn_fold(ks[11], c_stem),
        # head conv 1x1 + BN + hardswish
        "last_w": nrm(ks[12], (c_stem, c_last)),
        "last_bn": _bn_fold(ks[13], c_last),
        # classifier Conv2d 1x1 (with bias), appended when num_classes is set
        "cls_w": nrm(ks[14], (c_last, num_classes)),
        "cls_b": 0.01 * jax.random.normal(ks[15], (num_classes,), jnp.float32),
    }
    return p


def _pad_mat(w, scale=None):
    """(K, C) 1x1-conv weight -> (128, 128), BN scale folded into the columns."""
    k, c = w.shape
    if scale is not None:
        w = w * scale[None, :]
    return jnp.zeros((LANE, LANE), jnp.float32).at[:k, :c].set(w)


def _pad_vec(v):
    return jnp.zeros((LANE,), jnp.float32).at[:v.shape[0]].set(v)


def pack_mobilenet_params(p):
    """Fold eval-mode BN into the weights, zero-pad every channel dim to the
    128-lane width and stack the weights so the fused kernel sees only three
    weight arrays: a (7,128,128) bf16 matmul stack (stem im2col matrix + five
    1x1 convs + classifier), the raw depthwise taps, and the biases."""
    in_ch, c_stem = p["stem_w"].shape[2], p["stem_w"].shape[3]
    c_exp = p["exp_w"].shape[1]
    stem_scale, stem_bias = p["stem_bn"]
    exp_scale, exp_bias = p["exp_bn"]
    dw_scale, dw_bias = p["dw_bn"]
    proj_scale, proj_bias = p["proj_bn"]
    last_scale, last_bias = p["last_bn"]

    # Stem as an im2col matmul weight: K ordering is (dy, dx, cin), matching
    # the wrapper's patch extraction order.
    wstem_fold = (p["stem_w"] * stem_scale[None, None, None, :]).reshape(
        9 * in_ch, c_stem)
    wstem_mat = jnp.zeros((LANE, LANE), jnp.float32).at[
        :9 * in_ch, :c_stem].set(wstem_fold)

    wdw_fold = (p["dw_w"] * dw_scale[None, None, :]).reshape(9, c_exp)
    wdw = jnp.zeros((9, LANE), jnp.float32).at[:, :c_exp].set(wdw_fold)

    wmat = jnp.stack([
        wstem_mat,
        _pad_mat(p["exp_w"], exp_scale),
        _pad_mat(p["se_w1"]),
        _pad_mat(p["se_w2"]),
        _pad_mat(p["proj_w"], proj_scale),
        _pad_mat(p["last_w"], last_scale),
        _pad_mat(p["cls_w"]),
    ]).astype(jnp.bfloat16)

    biases = jnp.stack([
        _pad_vec(stem_bias), _pad_vec(exp_bias), _pad_vec(dw_bias),
        _pad_vec(p["se_b1"]), _pad_vec(p["se_b2"]), _pad_vec(proj_bias),
        _pad_vec(last_bias), _pad_vec(p["cls_b"]),
    ])

    return {"wmat": wmat, "wdw": wdw, "biases": biases}


# ----------------------------- forward pass ----------------------------------

def mobilenet_forward(packed, x_nchw, num_classes=10):
    assert num_classes <= LANE
    x = jnp.transpose(x_nchw, (0, 2, 3, 1)).astype(jnp.float32)  # NCHW -> NHWC
    N, H, W, Cin = x.shape
    assert H % 2 == 0 and W % 2 == 0
    assert 9 * Cin <= LANE
    Ho, Wo = H // 2, W // 2
    HW = Ho * Wo
    assert HW % 8 == 0  # sublane alignment of the flattened spatial dim

    B = _pick_batch_tile(N)

    # im2col of the SAME-padded stride-2 stem conv: (N, HW, 9*Cin), zero-padded
    # to the 128-lane width and pre-cast to bf16 (halves the input DMA; the
    # stem matmul accumulates in f32 on the MXU).
    xp = jnp.pad(x, ((0, 0), (1, 1), (1, 1), (0, 0)))
    taps = [xp[:, dy::2, dx::2, :][:, :Ho, :Wo, :]
            for dy in range(3) for dx in range(3)]
    xcol = jnp.stack(taps, axis=3).reshape(N, HW, 9 * Cin)
    xcol = jnp.pad(xcol, ((0, 0), (0, 0), (0, LANE - 9 * Cin))).astype(
        jnp.bfloat16)

    # Depthwise weights with the spatial boundary masks folded in, tiled per
    # image of the batch tile (so rolls on the flattened (B*HW,128) tile never
    # bleed valid data across image boundaries).
    flat = jnp.arange(HW, dtype=jnp.int32)
    row, col = flat // Wo, flat % Wo
    ones = jnp.ones((HW,), bool)
    rmask = [row >= 1, ones, row <= Ho - 2]
    cmask = [col >= 1, ones, col <= Wo - 2]
    masks = jnp.stack([(rmask[dy] & cmask[dx])
                       for dy in range(3) for dx in range(3)])   # (9, HW) bool
    wdwm = masks[:, :, None].astype(jnp.float32) * packed["wdw"][:, None, :]
    wdwm = jnp.tile(wdwm, (1, B, 1))                             # (9, B*HW, 128)

    logits = _mobilenet_pallas(xcol, packed["wmat"], wdwm, packed["biases"],
                               B=B, HW=HW, Wo=Wo)

    # TODO(synk): Dropout2d implemented as inference-mode identity (no channel dropping).

    # padded channels are exactly zero; slice back to the real classes
    return logits[:, :num_classes]        # == net.view(-1, num_classes)


if __name__ == "__main__":
    key = jax.random.PRNGKey(0)
    kx, kp = jax.random.split(key)
    num_classes = 10
    x = jax.random.normal(kx, (2, 4, 16, 16), jnp.float32)   # NCHW, like PyTorch
    params = init_mobilenet_params(kp, in_ch=4, num_classes=num_classes)
    packed = pack_mobilenet_params(params)

    fwd = jax.jit(functools.partial(mobilenet_forward, num_classes=num_classes))
    out = jax.block_until_ready(fwd(packed, x))

    assert out.shape == (2, num_classes), out.shape
    assert jnp.all(jnp.isfinite(out))
    print("KERNEL_OK")
</pallas_src>

<mosaic_0001>
module attributes {stable_mosaic.version = 11 : i64} {
  func.func @_mobilenet_fused_kernel(%arg0: i32, %arg1: memref<1x64x128xbf16, #tpu.memory_space<vmem>>, %arg2: memref<7x128x128xbf16, #tpu.memory_space<vmem>>, %arg3: memref<9x64x128xf32, #tpu.memory_space<vmem>>, %arg4: memref<8x128xf32, #tpu.memory_space<vmem>>, %arg5: memref<1x1x128xf32, #tpu.memory_space<vmem>>) attributes {dimension_semantics = [#tpu.dimension_semantics<parallel>], iteration_bounds = array<i64: 2>, scalar_prefetch = 0 : i64, scratch_operands = 0 : i64, tpu.core_type = #tpu.core_type<tc>, window_params = [{transform_indices = @transform_0, window_bounds = array<i64: 1, 64, 128>}, {pipeline_mode = #tpu.pipeline_mode<synchronous>, transform_indices = @transform_1, window_bounds = array<i64: 7, 128, 128>}, {pipeline_mode = #tpu.pipeline_mode<synchronous>, transform_indices = @transform_2, window_bounds = array<i64: 9, 64, 128>}, {pipeline_mode = #tpu.pipeline_mode<synchronous>, transform_indices = @transform_3, window_bounds = array<i64: 8, 128>}, {transform_indices = @transform_4, window_bounds = array<i64: 1, 1, 128>}]} {
    %c0 = arith.constant 0 : index
    %c0_0 = arith.constant 0 : index
    %c0_1 = arith.constant 0 : index
    %0 = vector.load %arg1[%c0, %c0_0, %c0_1] : memref<1x64x128xbf16, #tpu.memory_space<vmem>>, vector<1x64x128xbf16>
    %1 = vector.shape_cast %0 : vector<1x64x128xbf16> to vector<64x128xbf16>
    %c0_2 = arith.constant 0 : index
    %c0_3 = arith.constant 0 : index
    %c0_4 = arith.constant 0 : index
    %2 = vector.load %arg2[%c0_2, %c0_3, %c0_4] : memref<7x128x128xbf16, #tpu.memory_space<vmem>>, vector<1x128x128xbf16>
    %3 = vector.shape_cast %2 : vector<1x128x128xbf16> to vector<128x128xbf16>
    %cst = arith.constant dense<0.000000e+00> : vector<64x128xf32>
    %4 = tpu.matmul %1, %3, %cst {dimension_numbers = #tpu.dot_dimension_numbers<[1], [0], [0], [1], [0, 0, 1, 1], [], []>} : vector<64x128xbf16>, vector<128x128xbf16>, vector<64x128xf32> -> vector<64x128xf32>
    %c0_5 = arith.constant 0 : index
    %c0_6 = arith.constant 0 : index
    %5 = vector.load %arg4[%c0_5, %c0_6] : memref<8x128xf32, #tpu.memory_space<vmem>>, vector<1x128xf32>
    %6 = vector.shape_cast %5 : vector<1x128xf32> to vector<128xf32>
    %7 = vector.shape_cast %6 : vector<128xf32> to vector<1x128xf32>
    %8 = vector.broadcast %7 : vector<1x128xf32> to vector<64x128xf32>
    %9 = arith.addf %4, %8 : vector<64x128xf32>
    %cst_7 = arith.constant 3.000000e+00 : f32
    %10 = vector.broadcast %cst_7 : f32 to vector<64x128xf32>
    %11 = arith.addf %9, %10 : vector<64x128xf32>
    %cst_8 = arith.constant 0.000000e+00 : f32
    %cst_9 = arith.constant 6.000000e+00 : f32
    %12 = vector.broadcast %cst_8 : f32 to vector<64x128xf32>
    %13 = arith.maximumf %12, %11 : vector<64x128xf32>
    %14 = vector.broadcast %cst_9 : f32 to vector<64x128xf32>
    %15 = arith.minimumf %14, %13 : vector<64x128xf32>
    %16 = arith.mulf %9, %15 : vector<64x128xf32>
    %cst_10 = arith.constant 0.166666672 : f32
    %17 = vector.broadcast %cst_10 : f32 to vector<64x128xf32>
    %18 = arith.mulf %16, %17 : vector<64x128xf32>
    %19 = arith.truncf %18 : vector<64x128xf32> to vector<64x128xbf16>
    %c1 = arith.constant 1 : index
    %c0_11 = arith.constant 0 : index
    %c0_12 = arith.constant 0 : index
    %20 = vector.load %arg2[%c1, %c0_11, %c0_12] : memref<7x128x128xbf16, #tpu.memory_space<vmem>>, vector<1x128x128xbf16>
    %21 = vector.shape_cast %20 : vector<1x128x128xbf16> to vector<128x128xbf16>
    %cst_13 = arith.constant dense<0.000000e+00> : vector<64x128xf32>
    %22 = tpu.matmul %19, %21, %cst_13 {dimension_numbers = #tpu.dot_dimension_numbers<[1], [0], [0], [1], [0, 0, 1, 1], [], []>} : vector<64x128xbf16>, vector<128x128xbf16>, vector<64x128xf32> -> vector<64x128xf32>
    %c1_14 = arith.constant 1 : index
    %c0_15 = arith.constant 0 : index
    %23 = vector.load %arg4[%c1_14, %c0_15] : memref<8x128xf32, #tpu.memory_space<vmem>>, vector<1x128xf32>
    %24 = vector.shape_cast %23 : vector<1x128xf32> to vector<128xf32>
    %25 = vector.shape_cast %24 : vector<128xf32> to vector<1x128xf32>
    %26 = vector.broadcast %25 : vector<1x128xf32> to vector<64x128xf32>
    %27 = arith.addf %22, %26 : vector<64x128xf32>
    %cst_16 = arith.constant 0.000000e+00 : f32
    %28 = vector.broadcast %cst_16 : f32 to vector<64x128xf32>
    %29 = arith.maximumf %27, %28 : vector<64x128xf32>
    %c4 = arith.constant 4 : index
    %c0_17 = arith.constant 0 : index
    %c0_18 = arith.constant 0 : index
    %30 = vector.load %arg3[%c4, %c0_17, %c0_18] : memref<9x64x128xf32, #tpu.memory_space<vmem>>, vector<1x64x128xf32>
    %31 = vector.shape_cast %30 : vector<1x64x128xf32> to vector<64x128xf32>
    %32 = arith.mulf %29, %31 : vector<64x128xf32>
    %c9_i32 = arith.constant 9 : i32
    %33 = tpu.dynamic_rotate %29 by %c9_i32 dim 0 : vector<64x128xf32>, i32 -> vector<64x128xf32>
    %c0_19 = arith.constant 0 : index
    %c0_20 = arith.constant 0 : index
    %c0_21 = arith.constant 0 : index
    %34 = vector.load %arg3[%c0_19, %c0_20, %c0_21] : memref<9x64x128xf32, #tpu.memory_space<vmem>>, vector<1x64x128xf32>
    %35 = vector.shape_cast %34 : vector<1x64x128xf32> to vector<64x128xf32>
    %36 = arith.mulf %33, %35 : vector<64x128xf32>
    %37 = arith.addf %32, %36 : vector<64x128xf32>
    %c8_i32 = arith.constant 8 : i32
    %38 = tpu.dynamic_rotate %29 by %c8_i32 dim 0 : vector<64x128xf32>, i32 -> vector<64x128xf32>
    %c1_22 = arith.constant 1 : index
    %c0_23 = arith.constant 0 : index
    %c0_24 = arith.constant 0 : index
    %39 = vector.load %arg3[%c1_22, %c0_23, %c0_24] : memref<9x64x128xf32, #tpu.memory_space<vmem>>, vector<1x64x128xf32>
    %40 = vector.shape_cast %39 : vector<1x64x128xf32> to vector<64x128xf32>
    %41 = arith.mulf %38, %40 : vector<64x128xf32>
    %42 = arith.addf %37, %41 : vector<64x128xf32>
    %c7_i32 = arith.constant 7 : i32
    %43 = tpu.dynamic_rotate %29 by %c7_i32 dim 0 : vector<64x128xf32>, i32 -> vector<64x128xf32>
    %c2 = arith.constant 2 : index
    %c0_25 = arith.constant 0 : index
    %c0_26 = arith.constant 0 : index
    %44 = vector.load %arg3[%c2, %c0_25, %c0_26] : memref<9x64x128xf32, #tpu.memory_space<vmem>>, vector<1x64x128xf32>
    %45 = vector.shape_cast %44 : vector<1x64x128xf32> to vector<64x128xf32>
    %46 = arith.mulf %43, %45 : vector<64x128xf32>
    %47 = arith.addf %42, %46 : vector<64x128xf32>
    %c1_i32 = arith.constant 1 : i32
    %48 = tpu.dynamic_rotate %29 by %c1_i32 dim 0 : vector<64x128xf32>, i32 -> vector<64x128xf32>
    %c3 = arith.constant 3 : index
    %c0_27 = arith.constant 0 : index
    %c0_28 = arith.constant 0 : index
    %49 = vector.load %arg3[%c3, %c0_27, %c0_28] : memref<9x64x128xf32, #tpu.memory_space<vmem>>, vector<1x64x128xf32>
    %50 = vector.shape_cast %49 : vector<1x64x128xf32> to vector<64x128xf32>
    %51 = arith.mulf %48, %50 : vector<64x128xf32>
    %52 = arith.addf %47, %51 : vector<64x128xf32>
    %c63_i32 = arith.constant 63 : i32
    %53 = tpu.dynamic_rotate %29 by %c63_i32 dim 0 : vector<64x128xf32>, i32 -> vector<64x128xf32>
    %c5 = arith.constant 5 : index
    %c0_29 = arith.constant 0 : index
    %c0_30 = arith.constant 0 : index
    %54 = vector.load %arg3[%c5, %c0_29, %c0_30] : memref<9x64x128xf32, #tpu.memory_space<vmem>>, vector<1x64x128xf32>
    %55 = vector.shape_cast %54 : vector<1x64x128xf32> to vector<64x128xf32>
    %56 = arith.mulf %53, %55 : vector<64x128xf32>
    %57 = arith.addf %52, %56 : vector<64x128xf32>
    %c57_i32 = arith.constant 57 : i32
    %58 = tpu.dynamic_rotate %29 by %c57_i32 dim 0 : vector<64x128xf32>, i32 -> vector<64x128xf32>
    %c6 = arith.constant 6 : index
    %c0_31 = arith.constant 0 : index
    %c0_32 = arith.constant 0 : index
    %59 = vector.load %arg3[%c6, %c0_31, %c0_32] : memref<9x64x128xf32, #tpu.memory_space<vmem>>, vector<1x64x128xf32>
    %60 = vector.shape_cast %59 : vector<1x64x128xf32> to vector<64x128xf32>
    %61 = arith.mulf %58, %60 : vector<64x128xf32>
    %62 = arith.addf %57, %61 : vector<64x128xf32>
    %c56_i32 = arith.constant 56 : i32
    %63 = tpu.dynamic_rotate %29 by %c56_i32 dim 0 : vector<64x128xf32>, i32 -> vector<64x128xf32>
    %c7 = arith.constant 7 : index
    %c0_33 = arith.constant 0 : index
    %c0_34 = arith.constant 0 : index
    %64 = vector.load %arg3[%c7, %c0_33, %c0_34] : memref<9x64x128xf32, #tpu.memory_space<vmem>>, vector<1x64x128xf32>
    %65 = vector.shape_cast %64 : vector<1x64x128xf32> to vector<64x128xf32>
    %66 = arith.mulf %63, %65 : vector<64x128xf32>
    %67 = arith.addf %62, %66 : vector<64x128xf32>
    %c55_i32 = arith.constant 55 : i32
    %68 = tpu.dynamic_rotate %29 by %c55_i32 dim 0 : vector<64x128xf32>, i32 -> vector<64x128xf32>
    %c8 = arith.constant 8 : index
    %c0_35 = arith.constant 0 : index
    %c0_36 = arith.constant 0 : index
    %69 = vector.load %arg3[%c8, %c0_35, %c0_36] : memref<9x64x128xf32, #tpu.memory_space<vmem>>, vector<1x64x128xf32>
    %70 = vector.shape_cast %69 : vector<1x64x128xf32> to vector<64x128xf32>
    %71 = arith.mulf %68, %70 : vector<64x128xf32>
    %72 = arith.addf %67, %71 : vector<64x128xf32>
    %c2_37 = arith.constant 2 : index
    %c0_38 = arith.constant 0 : index
    %73 = vector.load %arg4[%c2_37, %c0_38] : memref<8x128xf32, #tpu.memory_space<vmem>>, vector<1x128xf32>
    %74 = vector.shape_cast %73 : vector<1x128xf32> to vector<128xf32>
    %75 = vector.shape_cast %74 : vector<128xf32> to vector<1x128xf32>
    %76 = vector.broadcast %75 : vector<1x128xf32> to vector<64x128xf32>
    %77 = arith.addf %72, %76 : vector<64x128xf32>
    %cst_39 = arith.constant 0.000000e+00 : f32
    %78 = vector.broadcast %cst_39 : f32 to vector<64x128xf32>
    %79 = arith.maximumf %77, %78 : vector<64x128xf32>
    %80 = vector.shape_cast %79 : vector<64x128xf32> to vector<1x64x128xf32>
    %cst_40 = arith.constant dense<0.000000e+00> : vector<1x128xf32>
    %81 = vector.multi_reduction <add>, %80, %cst_40 [1] : vector<1x64x128xf32> to vector<1x128xf32>
    %cst_41 = arith.constant 6.400000e+01 : f32
    %82 = vector.broadcast %cst_41 : f32 to vector<1x128xf32>
    %83 = arith.divf %81, %82 : vector<1x128xf32>
    %84 = arith.truncf %83 : vector<1x128xf32> to vector<1x128xbf16>
    %c2_42 = arith.constant 2 : index
    %c0_43 = arith.constant 0 : index
    %c0_44 = arith.constant 0 : index
    %85 = vector.load %arg2[%c2_42, %c0_43, %c0_44] : memref<7x128x128xbf16, #tpu.memory_space<vmem>>, vector<1x128x128xbf16>
    %86 = vector.shape_cast %85 : vector<1x128x128xbf16> to vector<128x128xbf16>
    %cst_45 = arith.constant dense<0.000000e+00> : vector<1x128xf32>
    %87 = tpu.matmul %84, %86, %cst_45 {dimension_numbers = #tpu.dot_dimension_numbers<[1], [0], [0], [1], [0, 0, 1, 1], [], []>} : vector<1x128xbf16>, vector<128x128xbf16>, vector<1x128xf32> -> vector<1x128xf32>
    %c3_46 = arith.constant 3 : index
    %c0_47 = arith.constant 0 : index
    %88 = vector.load %arg4[%c3_46, %c0_47] : memref<8x128xf32, #tpu.memory_space<vmem>>, vector<1x128xf32>
    %89 = vector.shape_cast %88 : vector<1x128xf32> to vector<128xf32>
    %90 = vector.shape_cast %89 : vector<128xf32> to vector<1x128xf32>
    %91 = arith.addf %87, %90 : vector<1x128xf32>
    %cst_48 = arith.constant 0.000000e+00 : f32
    %92 = vector.broadcast %cst_48 : f32 to vector<1x128xf32>
    %93 = arith.maximumf %91, %92 : vector<1x128xf32>
    %94 = arith.truncf %93 : vector<1x128xf32> to vector<1x128xbf16>
    %c3_49 = arith.constant 3 : index
    %c0_50 = arith.constant 0 : index
    %c0_51 = arith.constant 0 : index
    %95 = vector.load %arg2[%c3_49, %c0_50, %c0_51] : memref<7x128x128xbf16, #tpu.memory_space<vmem>>, vector<1x128x128xbf16>
    %96 = vector.shape_cast %95 : vector<1x128x128xbf16> to vector<128x128xbf16>
    %cst_52 = arith.constant dense<0.000000e+00> : vector<1x128xf32>
    %97 = tpu.matmul %94, %96, %cst_52 {dimension_numbers = #tpu.dot_dimension_numbers<[1], [0], [0], [1], [0, 0, 1, 1], [], []>} : vector<1x128xbf16>, vector<128x128xbf16>, vector<1x128xf32> -> vector<1x128xf32>
    %c4_53 = arith.constant 4 : index
    %c0_54 = arith.constant 0 : index
    %98 = vector.load %arg4[%c4_53, %c0_54] : memref<8x128xf32, #tpu.memory_space<vmem>>, vector<1x128xf32>
    %99 = vector.shape_cast %98 : vector<1x128xf32> to vector<128xf32>
    %100 = vector.shape_cast %99 : vector<128xf32> to vector<1x128xf32>
    %101 = arith.addf %97, %100 : vector<1x128xf32>
    %cst_55 = arith.constant 3.000000e+00 : f32
    %102 = vector.broadcast %cst_55 : f32 to vector<1x128xf32>
    %103 = arith.addf %101, %102 : vector<1x128xf32>
    %cst_56 = arith.constant 0.000000e+00 : f32
    %cst_57 = arith.constant 6.000000e+00 : f32
    %104 = vector.broadcast %cst_56 : f32 to vector<1x128xf32>
    %105 = arith.maximumf %104, %103 : vector<1x128xf32>
    %106 = vector.broadcast %cst_57 : f32 to vector<1x128xf32>
    %107 = arith.minimumf %106, %105 : vector<1x128xf32>
    %cst_58 = arith.constant 0.166666672 : f32
    %108 = vector.broadcast %cst_58 : f32 to vector<1x128xf32>
    %109 = arith.mulf %107, %108 : vector<1x128xf32>
    %110 = vector.shape_cast %109 : vector<1x128xf32> to vector<1x1x128xf32>
    %111 = vector.broadcast %110 : vector<1x1x128xf32> to vector<1x64x128xf32>
    %112 = arith.mulf %80, %111 : vector<1x64x128xf32>
    %113 = vector.shape_cast %112 : vector<1x64x128xf32> to vector<64x128xf32>
    %114 = arith.truncf %113 : vector<64x128xf32> to vector<64x128xbf16>
    %c4_59 = arith.constant 4 : index
    %c0_60 = arith.constant 0 : index
    %c0_61 = arith.constant 0 : index
    %115 = vector.load %arg2[%c4_59, %c0_60, %c0_61] : memref<7x128x128xbf16, #tpu.memory_space<vmem>>, vector<1x128x128xbf16>
    %116 = vector.shape_cast %115 : vector<1x128x128xbf16> to vector<128x128xbf16>
    %cst_62 = arith.constant dense<0.000000e+00> : vector<64x128xf32>
    %117 = tpu.matmul %114, %116, %cst_62 {dimension_numbers = #tpu.dot_dimension_numbers<[1], [0], [0], [1], [0, 0, 1, 1], [], []>} : vector<64x128xbf16>, vector<128x128xbf16>, vector<64x128xf32> -> vector<64x128xf32>
    %c5_63 = arith.constant 5 : index
    %c0_64 = arith.constant 0 : index
    %118 = vector.load %arg4[%c5_63, %c0_64] : memref<8x128xf32, #tpu.memory_space<vmem>>, vector<1x128xf32>
    %119 = vector.shape_cast %118 : vector<1x128xf32> to vector<128xf32>
    %120 = vector.shape_cast %119 : vector<128xf32> to vector<1x128xf32>
    %121 = vector.broadcast %120 : vector<1x128xf32> to vector<64x128xf32>
    %122 = arith.addf %117, %121 : vector<64x128xf32>
    %123 = arith.addf %122, %18 : vector<64x128xf32>
    %124 = arith.truncf %123 : vector<64x128xf32> to vector<64x128xbf16>
    %c5_65 = arith.constant 5 : index
    %c0_66 = arith.constant 0 : index
    %c0_67 = arith.constant 0 : index
    %125 = vector.load %arg2[%c5_65, %c0_66, %c0_67] : memref<7x128x128xbf16, #tpu.memory_space<vmem>>, vector<1x128x128xbf16>
    %126 = vector.shape_cast %125 : vector<1x128x128xbf16> to vector<128x128xbf16>
    %cst_68 = arith.constant dense<0.000000e+00> : vector<64x128xf32>
    %127 = tpu.matmul %124, %126, %cst_68 {dimension_numbers = #tpu.dot_dimension_numbers<[1], [0], [0], [1], [0, 0, 1, 1], [], []>} : vector<64x128xbf16>, vector<128x128xbf16>, vector<64x128xf32> -> vector<64x128xf32>
    %c6_69 = arith.constant 6 : index
    %c0_70 = arith.constant 0 : index
    %128 = vector.load %arg4[%c6_69, %c0_70] : memref<8x128xf32, #tpu.memory_space<vmem>>, vector<1x128xf32>
    %129 = vector.shape_cast %128 : vector<1x128xf32> to vector<128xf32>
    %130 = vector.shape_cast %129 : vector<128xf32> to vector<1x128xf32>
    %131 = vector.broadcast %130 : vector<1x128xf32> to vector<64x128xf32>
    %132 = arith.addf %127, %131 : vector<64x128xf32>
    %cst_71 = arith.constant 3.000000e+00 : f32
    %133 = vector.broadcast %cst_71 : f32 to vector<64x128xf32>
    %134 = arith.addf %132, %133 : vector<64x128xf32>
    %cst_72 = arith.constant 0.000000e+00 : f32
    %cst_73 = arith.constant 6.000000e+00 : f32
    %135 = vector.broadcast %cst_72 : f32 to vector<64x128xf32>
    %136 = arith.maximumf %135, %134 : vector<64x128xf32>
    %137 = vector.broadcast %cst_73 : f32 to vector<64x128xf32>
    %138 = arith.minimumf %137, %136 : vector<64x128xf32>
    %139 = arith.mulf %132, %138 : vector<64x128xf32>
    %cst_74 = arith.constant 0.166666672 : f32
    %140 = vector.broadcast %cst_74 : f32 to vector<64x128xf32>
    %141 = arith.mulf %139, %140 : vector<64x128xf32>
    %142 = vector.shape_cast %141 : vector<64x128xf32> to vector<1x64x128xf32>
    %cst_75 = arith.constant dense<0.000000e+00> : vector<1x128xf32>
    %143 = vector.multi_reduction <add>, %142, %cst_75 [1] : vector<1x64x128xf32> to vector<1x128xf32>
    %cst_76 = arith.constant 6.400000e+01 : f32
    %144 = vector.broadcast %cst_76 : f32 to vector<1x128xf32>
    %145 = arith.divf %143, %144 : vector<1x128xf32>
    %146 = arith.truncf %145 : vector<1x128xf32> to vector<1x128xbf16>
    %c6_77 = arith.constant 6 : index
    %c0_78 = arith.constant 0 : index
    %c0_79 = arith.constant 0 : index
    %147 = vector.load %arg2[%c6_77, %c0_78, %c0_79] : memref<7x128x128xbf16, #tpu.memory_space<vmem>>, vector<1x128x128xbf16>
    %148 = vector.shape_cast %147 : vector<1x128x128xbf16> to vector<128x128xbf16>
    %cst_80 = arith.constant dense<0.000000e+00> : vector<1x128xf32>
    %149 = tpu.matmul %146, %148, %cst_80 {dimension_numbers = #tpu.dot_dimension_numbers<[1], [0], [0], [1], [0, 0, 1, 1], [], []>} : vector<1x128xbf16>, vector<128x128xbf16>, vector<1x128xf32> -> vector<1x128xf32>
    %c7_81 = arith.constant 7 : index
    %c0_82 = arith.constant 0 : index
    %150 = vector.load %arg4[%c7_81, %c0_82] : memref<8x128xf32, #tpu.memory_space<vmem>>, vector<1x128xf32>
    %151 = vector.shape_cast %150 : vector<1x128xf32> to vector<128xf32>
    %152 = vector.shape_cast %151 : vector<128xf32> to vector<1x128xf32>
    %153 = arith.addf %149, %152 : vector<1x128xf32>
    %c0_83 = arith.constant 0 : index
    %c0_84 = arith.constant 0 : index
    %c0_85 = arith.constant 0 : index
    %154 = vector.load %arg5[%c0_83, %c0_84, %c0_85] : memref<1x1x128xf32, #tpu.memory_space<vmem>>, vector<1x1x128xf32>
    %155 = vector.shape_cast %154 : vector<1x1x128xf32> to vector<1x128xf32>
    %156 = vector.shape_cast %153 : vector<1x128xf32> to vector<1x1x128xf32>
    tpu.vector_store %arg5[%c0_83, %c0_84, %c0_85], %156 {strides = array<i32>} : memref<1x1x128xf32, #tpu.memory_space<vmem>>, vector<1x1x128xf32>,
    return
  }
  func.func @transform_0(%arg0: i32) -> (i32, i32, i32) {
    %c0_i32 = arith.constant 0 : i32
    %c0_i32_0 = arith.constant 0 : i32
    %c0_i32_1 = arith.constant 0 : i32
    return %arg0, %c0_i32, %c0_i32_0 : i32, i32, i32
  }
  func.func @transform_1(%arg0: i32) -> (i32, i32, i32) {
    %c0_i32 = arith.constant 0 : i32
    %c0_i32_0 = arith.constant 0 : i32
    %c0_i32_1 = arith.constant 0 : i32
    %c0_i32_2 = arith.constant 0 : i32
    return %c0_i32, %c0_i32_0, %c0_i32_1 : i32, i32, i32
  }
  func.func @transform_2(%arg0: i32) -> (i32, i32, i32) {
    %c0_i32 = arith.constant 0 : i32
    %c0_i32_0 = arith.constant 0 : i32
    %c0_i32_1 = arith.constant 0 : i32
    %c0_i32_2 = arith.constant 0 : i32
    return %c0_i32, %c0_i32_0, %c0_i32_1 : i32, i32, i32
  }
  func.func @transform_3(%arg0: i32) -> (i32, i32) {
    %c0_i32 = arith.constant 0 : i32
    %c0_i32_0 = arith.constant 0 : i32
    %c0_i32_1 = arith.constant 0 : i32
    return %c0_i32, %c0_i32_0 : i32, i32
  }
  func.func @transform_4(%arg0: i32) -> (i32, i32, i32) {
    %c0_i32 = arith.constant 0 : i32
    %c0_i32_0 = arith.constant 0 : i32
    %c0_i32_1 = arith.constant 0 : i32
    return %arg0, %c0_i32, %c0_i32_0 : i32, i32, i32
  }
}

</mosaic_0001>

<bundles_post_ra>
// kernel: mobilenet_forward.1
= control target key start
LH: loop header
LB: loop body
LE: loop exit
PB: predicated region body
PF: predicated region fallthrough
CT: control target
= control target key end

     0   :  { %9 = vsyncpa [#allocation3], 0  ;;  %s3095_s0 = inlined_call_operand.vmem [shape: bf16[2,64,128], index: 0, kind: input, shape index: {}]   ;;  %s3096_s1 = inlined_call_operand.vmem [shape: bf16[7,128,128], index: 1, kind: input, shape index: {}]   ;;  %s3097_s2 = inlined_call_operand.vmem [shape: f32[9,64,128], index: 2, kind: input, shape index: {}]   ;;  %s3098_s3 = inlined_call_operand.vmem [shape: f32[8,128], index: 3, kind: input, shape index: {}]   ;;  %s3099_s4 = inlined_call_operand.hbm [shape: f32[2,1,128], index: 4, kind: output, shape index: {}]  }
   0x1   :  { %11 = vsyncpa [#allocation3 + $0x1], 0  ;;  %s2241_s15 = smov 0   ;;  %s2243_s16 = smov 0  }
   0x2   :  { %s2245_s17 = smov 0   ;;  %s2247_s18 = smov 0  }
   0x3 LB: > { %s2262_s19 = sadd.s32 4294967295, %s2211_s18   ;;  %s1584_s20 = sadd.s32 4294967294, %s2211_s18   ;;  %s2211_s18 = sphi %s2247_s18, %s3114_s18   ;;  %s2207_s17 = sphi %s2245_s17, %s3113_s17   ;;  %s2203_s16 = sphi %s2243_s16, %s3112_s16   ;;  %s2199_s15 = sphi %s2241_s15, %s3111_s15  }
   0x4   : > { %s2266_s21 = sadd.s32 1, %s2211_s18   ;;  %s113_s22 = sadd.s32 1, %s2207_s17 }
   0x5   : > { %s110_s23 = ssub.s32 %s2211_s18, %s2266_s21  ;;  %p123_p0 = scmp.ne.s32.totalorder %s2207_s17, %s2203_s16 }
   0x6   : > { %p111_p1 = scmp.eq.s32.totalorder %s110_s23, 0  ;;  %p124_p2 = scmp.eq.s32.totalorder %s2262_s19, 1 }
   0x7   : > { %p129_p3 = scmp.ne.s32.totalorder %s2203_s16, %s2199_s15  ;;  %p130_p4 = scmp.eq.s32.totalorder %s1584_s20, 1 }
   0x8   : > { %s2277_s24 = scalar_select %p111_p1, %s2207_s17, %s113_s22  }
   0x9   : > { %p2279_p5 = por %p124_p2, %p123_p0  ;;  %p2283_p6 = por %p130_p4, %p129_p3 }
   0xa   : > { %p1587_p7 = scmp.ge.s32.totalorder %s2211_s18, 1  ;;  %p165_p8 = scmp.lt.s32.totalorder %s2211_s18, 3 }
   0xc   : > { %p166_p9 = pnand %p1587_p7, %p165_p8 }
   0xd   : > { %p190_p10 = scmp.lt.s32.totalorder (!%p166_p9), %s2262_s19, 1  ;;  %s188_s30 = sand.u32 (!%p166_p9), 1, %s2203_s16  }
   0xe   : > { %169 = sbr.rel (%p166_p9) target bundleno = 1606 (0x646), region = 36  ;;  %s1815_s7 = sshll.u32 (!%p166_p9), %s2262_s19, 4 }
   0xf   : > { %s3054_s13 = scalar_lea.hbm (!%p166_p9), %s3099_s4, %s1815_s7  ;;  %s1517_s14 = scalar_lea.sflag (!%p166_p9), [#allocation3], %s188_s30 }
  0x13   : > { %v2091_v0 = vld [vmem:[%s3096_s1 + $0x38] sm:$0xff]   ;;  %v2092_v1 = vld [vmem:[%s3096_s1 + $0x30] sm:$0xff]   ;;  %s191_s5 = scalar_select %p190_p10, %s2262_s19, 1  ;;  %v2093_v2 = vld [vmem:[%s3096_s1 + $0x28] sm:$0xff]   ;;  %vm2214_vm0 = vmmov 0  }
  0x14   : > { %1894 = vmatprep.subr.bf16.mxu0 %v2091_v0  ;;  %v2094_v3 = vld [vmem:[%s3096_s1 + $0x20] sm:$0xff]   ;;  %v2095_v5 = vld [vmem:[%s3096_s1 + $0x18] sm:$0xff]   ;;  %v2104_v7 = vld [vmem:[%s3096_s1 + $0x70] sm:$0xff]   ;;  %s2215_s19 = smov [#allocation2]  }
  0x15   : > { %1895 = vmatpush3.bf16.msra.mxu0 %v2091_v0  ;;  %s1818_s8 = sshll.u32 %s191_s5, 5  ;;  %v2103_v6 = vld [vmem:[%s3096_s1 + $0x78] sm:$0xff]   ;;  %v2096_v8 = vld [vmem:[%s3096_s1 + $0x10] sm:$0xff]   ;;  %v2105_v9 = vld [vmem:[%s3096_s1 + $0x68] sm:$0xff]   ;;  %s2155_s22 = sshll.u32 %s2215_s19, 4  ;;  %s2156_s22 = int_to_ptr.vmem [resolvable:$false] %s2155_s22 }
  0x16   : > { %1896 = vmatprep.subr.bf16.mxu0 %v2092_v1  ;;  %s2303_s11 = scalar_lea.vmem %s3095_s0, %s1818_s8  ;;  %1918 = vmatprep.subr.bf16.mxu1 %v2103_v6  ;;  %v2097_v10 = vld [vmem:[%s3096_s1 + $0x8] sm:$0xff]   ;;  %v2098_v11 = vld [vmem:[%s3096_s1] sm:$0xff]   ;;  %v2107_v16 = vld [vmem:[%s3096_s1 + $0x58] sm:$0xff]   ;;  %s189_s8 = scalar_lea.vmem [#allocation2], %s188_s30 }
  0x17   : > { %v2099_v4 = vld [vmem:[%s2303_s11] sm:$0xff]   ;;  %1919 = vmatpush3.bf16.msra.mxu1 %v2103_v6  ;;  %v2100_v12 = vld [vmem:[%s2303_s11 + $0x8] sm:$0xff]   ;;  %v2101_v13 = vld [vmem:[%s2303_s11 + $0x10] sm:$0xff]   ;;  %s1529_s9 = sshll.u32 %s189_s8, 4  ;;  %s2157_s23 = scalar_lea.vmem %s2156_s22, 32  ;;  %s3056_s9 = int_to_ptr.vmem [resolvable:$true] %s1529_s9 }
  0x18   : > { %1910 = vmatprep.mubr.bf16.mxu0 %v2099_v4  ;;  %1920 = vmatprep.subr.bf16.mxu1 %v2104_v7  ;;  %v2102_v14 = vld [vmem:[%s2303_s11 + $0x18] sm:$0xff]   ;;  %v2106_v15 = vld [vmem:[%s3096_s1 + $0x60] sm:$0xff]   ;;  %v2108_v17 = vld [vmem:[%s3096_s1 + $0x50] sm:$0xff]   ;;  %s2151_s20 = scalar_lea.vmem %s3056_s9, 16  ;;  %p2158_p0 = scmp.lt.s32.totalorder %s3056_s9, %s2156_s22 }
  0x19   : > { %1897 = vmatpush3.bf16.msra.mxu0 %v2092_v1  ;;  %v2109_v18 = vld [vmem:[%s3096_s1 + $0x48] sm:$0xff]   ;;  %v2110_v19 = vld [vmem:[%s3096_s1 + $0x40] sm:$0xff]   ;;  %p2152_p11 = scmp.ne.s32.totalorder %s3056_s9, %s2151_s20  ;;  %p2159_p1 = scmp.lt.s32.totalorder %s2157_s23, %s2151_s20 }
  0x1a   : > { %1898 = vmatprep.subr.bf16.mxu0 %v2093_v2  ;;  %v1590_v20 = vld [vmem:[%s3098_s3] ss:$0 sm:$0xff] }
  0x1b   : > { %1921 = vmatpush3.bf16.msra.mxu1 %v2104_v7  ;;  %p2153_p12 = pnand %p2152_p11, %p2279_p5  ;;  %p2160_p2 = por %p2159_p1, %p2158_p0 }
  0x1c   : > { %1922 = vmatprep.subr.bf16.mxu1 %v2105_v9 }
  0x1d   : > { %1899 = vmatpush3.bf16.msra.mxu0 %v2093_v2  ;;  %p2154_p13 = pneg %p2153_p12 }
  0x1e   : > { %1900 = vmatprep.subr.bf16.mxu0 %v2094_v3 }
  0x1f   : > { %1923 = vmatpush3.bf16.msra.mxu1 %v2105_v9  ;;  %p2161_p3 = pnand %p2160_p2, %p2154_p13 }
  0x20   : > { %1924 = vmatprep.subr.bf16.mxu1 %v2106_v15 }
  0x21   : > { %1901 = vmatpush3.bf16.msra.mxu0 %v2094_v3 }
  0x22   : > { %1902 = vmatprep.subr.bf16.mxu0 %v2095_v5 }
  0x23   : > { %1925 = vmatpush3.bf16.msra.mxu1 %v2106_v15 }
  0x24   : > { %1926 = vmatprep.subr.bf16.mxu1 %v2107_v16 }
  0x25   : > { %1903 = vmatpush3.bf16.msra.mxu0 %v2095_v5 }
  0x26   : > { %1904 = vmatprep.subr.bf16.mxu0 %v2096_v8 }
  0x27   : > { %1927 = vmatpush3.bf16.msra.mxu1 %v2107_v16 }
  0x28   : > { %1928 = vmatprep.subr.bf16.mxu1 %v2108_v17 }
  0x29   : > { %1905 = vmatpush3.bf16.msra.mxu0 %v2096_v8 }
  0x2a   : > { %1906 = vmatprep.subr.bf16.mxu0 %v2097_v10 }
  0x2b   : > { %1929 = vmatpush3.bf16.msra.mxu1 %v2108_v17  ;;  %v2111_v17 = vld [vmem:[%s3096_s1 + $0xb8] sm:$0xff]  }
  0x2c   : > { %1930 = vmatprep.subr.bf16.mxu1 %v2109_v18 }
  0x2d   : > { %1907 = vmatpush3.bf16.msra.mxu0 %v2097_v10 }
  0x2e   : > { %1908 = vmatprep.subr.bf16.mxu0 %v2098_v11 }
  0x2f   : > { %1931 = vmatpush3.bf16.msra.mxu1 %v2109_v18  ;;  %v3100_v18 = vmov 0.0  }
  0x30   : > { %1932 = vmatprep.subr.bf16.mxu1 %v2110_v19 }
  0x31   : > { %1909 = vmatpush3.bf16.msra.mxu0 %v2098_v11 }
  0x32   : > { %1942 = vmatprep.subr.bf16.mxu0 %v3100_v18 }
  0x33   : > { %1933 = vmatpush3.bf16.msra.mxu1 %v2110_v19  ;;  %v2112_v19 = vld [vmem:[%s3096_s1 + $0xb0] sm:$0xff]  }
  0x34   : > { %1911 = vmatmul.mubr.bf16.vlgmr.msra.gmra.mxu0 %v2100_v12  ;;  %1962 = vmatprep.subr.bf16.mxu1 %v3100_v18 }
  0x35   : > { %1914 = vmatprep.mubr.bf16.mxu0 %v2101_v13  ;;  %1943 = vmatpush3.bf16.msra.mxu0 %v2111_v17  ;;  %v588_v17 = vld [vmem:[%s3097_s2 + $0x18] sm:$0xff] }
  0x36   : > { %1944 = vmatprep.subr.bf16.mxu0 %v3100_v18 }
  0x39   : > { %1945 = vmatpush3.bf16.msra.mxu0 %v2112_v19 }
  0x3a   : > { %1946 = vmatprep.subr.bf16.mxu0 %v3100_v18 }
  0x3c   : > { %1915 = vmatmul.mubr.bf16.gmra.mxu0 %v2102_v14 }
  0x3d   : > { %1958 = vmatprep.mubr.msk.bf16.mxu0 %vm2214_vm0, %v3100_v18 }
  0xf4   : > { %v1912_v21 = vpop.f32.mrf.mxu0 }
  0xf5   : > { %v340_v22 = vadd.f32 %v1912_v21, %v1590_v20  ;;  %v2114_v21 = vld [vmem:[%s3096_s1 + $0xa0] sm:$0xff]  }
  0xf6   : > { %v331_v23 = vpop.f32.mrf.mxu0 }
  0xf7   : > { %v364_v24 = vadd.f32 3.0, %v340_v22  ;;  %v332_v25 = vadd.f32 %v1590_v20, %v331_v23  ;;  %v2116_v23 = vld [vmem:[%s3096_s1 + $0x90] sm:$0xff]  }
  0xf8   : > { %v1913_v26 = vpop.f32.mrf.mxu0 }
  0xf9   : > { %v362_v27 = vadd.f32 3.0, %v332_v25  ;;  %v343_v28 = vadd.f32 %v1913_v26, %v1590_v20  ;;  %v372_v29 = vmax.f32 %v364_v24, 0.0  ;;  %v2117_v24 = vld [vmem:[%s3096_s1 + $0x88] sm:$0xff]   ;;  %v2118_v26 = vld [vmem:[%s3096_s1 + $0x80] sm:$0xff]  }
  0xfa   : > { %v334_v30 = vpop.f32.mrf.mxu0 }
  0xfb   : > { %v370_v31 = vmax.f32 %v362_v27, 0.0  ;;  %v365_v32 = vadd.f32 3.0, %v343_v28  ;;  %v335_v33 = vadd.f32 %v1590_v20, %v334_v30  ;;  %v380_v37 = vmin.f32 %v372_v29, 6.0  ;;  %v2120_v27 = vld [vmem:[%s3096_s1 + $0xf0] sm:$0xff]   ;;  %v2122_v29 = vld [vmem:[%s3096_s1 + $0xe0] sm:$0xff]   ;;  %v2123_v30 = vld [vmem:[%s3096_s1 + $0xd8] sm:$0xff]  }
  0xfc   : > { %v1916_v34 = vpop.f32.mrf.mxu0 }
  0xfd   : > { %v373_v35 = vmax.f32 %v365_v32, 0.0  ;;  %v363_v36 = vadd.f32 3.0, %v335_v33  ;;  %v378_v38 = vmin.f32 %v370_v31, 6.0  ;;  %v356_v39 = vadd.f32 %v1916_v34, %v1590_v20  ;;  %v2124_v31 = vld [vmem:[%s3096_s1 + $0xd0] sm:$0xff]   ;;  %v2439_v32 = vld [vmem:[%s3098_s3 + $0x1] ss:$0 sm:$0xff] }
  0xfe   : > { %v347_v40 = vpop.f32.mrf.mxu0  ;;  %v388_v50 = vmul.f32 %v380_v37, %v340_v22  ;;  %v2115_v22 = vld [vmem:[%s3096_s1 + $0x98] sm:$0xff]   ;;  %v574_v34 = vlaneseq }
  0xff   : > { %v381_v41 = vmin.f32 %v373_v35, 6.0  ;;  %v371_v42 = vmax.f32 %v363_v36, 0.0  ;;  %v348_v43 = vadd.f32 %v1590_v20, %v347_v40  ;;  %v368_v44 = vadd.f32 3.0, %v356_v39 }
 0x100   : > { %v1917_v45 = vpop.f32.mrf.mxu0  ;;  %v386_v52 = vmul.f32 %v378_v38, %v332_v25  ;;  %v2357_v0 = vmul.f32 0.16666667, %v388_v50  ;;  %v2119_v25 = vld [vmem:[%s3096_s1 + $0xf8] sm:$0xff]  }
 0x101   : > { %v389_v46 = vmul.f32 %v381_v41, %v343_v28  ;;  %v379_v47 = vmin.f32 %v371_v42, 6.0  ;;  %v366_v48 = vadd.f32 3.0, %v348_v43  ;;  %v359_v49 = vadd.f32 %v1917_v45, %v1590_v20  ;;  %v2121_v28 = vld [vmem:[%s3096_s1 + $0xe8] sm:$0xff]  }
 0x102   : > { %v350_v51 = vpop.f32.mrf.mxu0  ;;  %v376_v53 = vmax.f32 %v368_v44, 0.0  ;;  %v2353_v62 = vmul.f32 0.16666667, %v386_v52  ;;  %v1639_v44 = vld [vmem:[%s3097_s2 + $0x58] sm:$0xff] }
 0x103   : > { %v374_v54 = vmax.f32 %v366_v48, 0.0  ;;  %v369_v55 = vadd.f32 3.0, %v359_v49  ;;  %v351_v56 = vadd.f32 %v1590_v20, %v350_v51  ;;  %v387_v57 = vmul.f32 %v379_v47, %v335_v33  ;;  %v2113_v20 = vld [vmem:[%s3096_s1 + $0xa8] sm:$0xff]   ;;  %v1628_v48 = vld [vmem:[%s3097_s2 + $0x100] sm:$0xff] }
 0x104   : > { %v2351_v58 = vmul.f32 0.16666667, %v389_v46  ;;  %v384_v1 = vmin.f32 %v376_v53, 6.0  ;;  %1947 = vmatpush3.bf16.msra.mxu0 %v2113_v20  ;;  %v1677_v46 = vld [vmem:[%s3097_s2 + $0x1c8] sm:$0xff] }
 0x105   : > { %v382_v59 = vmin.f32 %v374_v54, 6.0  ;;  %v377_v60 = vmax.f32 %v369_v55, 0.0  ;;  %v367_v61 = vadd.f32 3.0, %v351_v56  ;;  %v2355_v63 = vmul.f32 0.16666667, %v387_v57  ;;  %1948 = vmatprep.subr.bf16.mxu0 %v3100_v18 }
 0x106   : > { %v403_v8 = vpack.c.bf16 %v2351_v58, %v2357_v0  ;;  %v392_v9 = vmul.f32 %v384_v1, %v356_v39  ;;  %v2443_v39 = vshrl.u32 %v574_v34, 7  ;;  %v1640_v1 = vld [vmem:[%s3097_s2 + $0x60] sm:$0xff] }
 0x107   : > { %v385_v2 = vmin.f32 %v377_v60, 6.0  ;;  %v375_v3 = vmax.f32 %v367_v61, 0.0  ;;  %v402_v4 = vpack.c.bf16 %v2355_v63, %v2353_v62  ;;  %v390_v5 = vmul.f32 %v382_v59, %v348_v43  ;;  %v1630_v43 = vld [vmem:[%s3097_s2 + $0x110] sm:$0xff]  ;;  %v1631_v60 = vld [vmem:[%s3097_s2 + $0x118] sm:$0xff] }
 0x108   : > { %v2369_v14 = vmul.f32 0.16666667, %v392_v9  ;;  %1949 = vmatpush3.bf16.msra.mxu0 %v2114_v21  ;;  %vm576_vm1 = vcmp.lt.s32.totalorder %v2443_v39, 1  ;;  %vm642_vm2 = vcmp.lt.s32.totalorder %v2443_v39, 7 }
 0x109   : > { %v393_v6 = vmul.f32 %v385_v2, %v359_v49  ;;  %v383_v7 = vmin.f32 %v375_v3, 6.0  ;;  %1934 = vmatprep.mubr.bf16.mxu1 %v402_v4  ;;  %v2363_v11 = vmul.f32 0.16666667, %v390_v5  ;;  %1950 = vmatprep.subr.bf16.mxu0 %v3100_v18  ;;  %v1637_v49 = vld [vmem:[%s3097_s2 + $0x48] sm:$0xff] }
 0x10a   : > { %1935 = vmatmul.mubr.bf16.vlgmr.msra.gmra.mxu1 %v403_v8 }
 0x10b   : > { %v391_v10 = vmul.f32 %v383_v7, %v351_v56  ;;  %v2365_v12 = vmul.f32 0.16666667, %v393_v6  ;;  %1963 = vmatpush3.bf16.msra.mxu1 %v2119_v25  ;;  %v1683_v56 = vld [vmem:[%s3097_s2 + $0x1f8] sm:$0xff]  ;;  %v1678_v6 = vld [vmem:[%s3097_s2 + $0x1d0] sm:$0xff]  ;;  %v1629_v7 = vld [vmem:[%s3097_s2 + $0x108] sm:$0xff] }
 0x10c   : > { %1951 = vmatpush3.bf16.msra.mxu0 %v2115_v22  ;;  %1964 = vmatprep.subr.bf16.mxu1 %v3100_v18 }
 0x10d   : > { %v2367_v13 = vmul.f32 0.16666667, %v391_v10  ;;  %v405_v16 = vpack.c.bf16 %v2365_v12, %v2369_v14  ;;  %1952 = vmatprep.subr.bf16.mxu0 %v3100_v18 }
 0x10f   : > { %v404_v15 = vpack.c.bf16 %v2367_v13, %v2363_v11  ;;  %1965 = vmatpush3.bf16.msra.mxu1 %v2120_v27  ;;  %v1638_v27 = vld [vmem:[%s3097_s2 + $0x50] sm:$0xff] }
 0x110   : > { %1953 = vmatpush3.bf16.msra.mxu0 %v2116_v23  ;;  %1966 = vmatprep.subr.bf16.mxu1 %v3100_v18 }
 0x111   : > { %1938 = vmatprep.mubr.bf16.mxu1 %v404_v15  ;;  %1954 = vmatprep.subr.bf16.mxu0 %v3100_v18  ;;  %v1647_v15 = vld [vmem:[%s3097_s2 + $0x98] sm:$0xff] }
 0x112   : > { %1939 = vmatmul.mubr.bf16.gmra.mxu1 %v405_v16  ;;  %v587_v16 = vld [vmem:[%s3097_s2 + $0x10] sm:$0xff] }
 0x113   : > { %1978 = vmatprep.mubr.msk.bf16.mxu1 %vm2214_vm0, %v3100_v18  ;;  %1967 = vmatpush3.bf16.msra.mxu1 %v2121_v28  ;;  %v1676_v28 = vld [vmem:[%s3097_s2 + $0x1c0] sm:$0xff] }
 0x114   : > { %1955 = vmatpush3.bf16.msra.mxu0 %v2117_v24  ;;  %1968 = vmatprep.subr.bf16.mxu1 %v3100_v18 }
 0x115   : > { %1956 = vmatprep.subr.bf16.mxu0 %v3100_v18 }
 0x117   : > { %1969 = vmatpush3.bf16.msra.mxu1 %v2122_v29  ;;  %v1662_v29 = vld [vmem:[%s3097_s2 + $0x150] sm:$0xff] }
 0x118   : > { %1957 = vmatpush3.bf16.msra.mxu0 %v2118_v26  ;;  %1970 = vmatprep.subr.bf16.mxu1 %v3100_v18  ;;  %v1655_v26 = vld [vmem:[%s3097_s2 + $0xd8] sm:$0xff] }
 0x11b   : > { %1971 = vmatpush3.bf16.msra.mxu1 %v2123_v30  ;;  %v1670_v30 = vld [vmem:[%s3097_s2 + $0x190] sm:$0xff] }
 0x11c   : > { %1972 = vmatprep.subr.bf16.mxu1 %v3100_v18 }
 0x11f   : > { %1973 = vmatpush3.bf16.msra.mxu1 %v2124_v31 }
 0x120   : > { %1974 = vmatprep.subr.bf16.mxu1 %v3100_v18 }
 0x1ca   : > { %v1936_v33 = vpop.f32.mrf.mxu1 }
 0x1cb   : > { %v519_v35 = vadd.f32 %v1936_v33, %v2439_v32 }
 0x1cc   : > { %v510_v36 = vpop.f32.mrf.mxu1 }
 0x1cd   : > { %v511_v37 = vadd.f32 %v2439_v32, %v510_v36  ;;  %v543_v40 = vmax.f32 %v519_v35, 0.0  ;;  %v1685_v36 = vld [vmem:[%s3097_s2 + $0x208] sm:$0xff] }
 0x1ce   : > { %v1937_v38 = vpop.f32.mrf.mxu1 }
 0x1cf   : > { %v522_v41 = vadd.f32 %v1937_v38, %v2439_v32  ;;  %v2456_v47 = vmax.f32 %v511_v37, 0.0  ;;  %v560_v53 = vmul.f32 %v1630_v43, %v543_v40  ;;  %v568_v54 = vrot.slane %v543_v40, 7  ;;  %v1646_v43 = vld [vmem:[%s3097_s2 + $0x90] sm:$0xff] }
 0x1d0   : > { %v513_v42 = vpop.f32.mrf.mxu1  ;;  %v2467_v55 = vmul.f32 %v1639_v44, %v543_v40  ;;  %v636_v57 = vrot.slane %v543_v40, 1  ;;  %v2473_v59 = vmul.f32 %v1677_v46, %v543_v40 }
 0x1d1   : > { %v514_v45 = vadd.f32 %v2439_v32, %v513_v42  ;;  %v2464_v50 = vmax.f32 %v522_v41, 0.0  ;;  %v2484_v3 = vmul.f32 %v1628_v48, %v2456_v47  ;;  %v566_v4 = vrot.slane %v2456_v47, 7  ;;  %v1645_v42 = vld [vmem:[%s3097_s2 + $0x88] sm:$0xff] }
 0x1d2   : > { %v1940_v52 = vpop.f32.mrf.mxu1  ;;  %v2488_v5 = vmul.f32 %v1637_v49, %v2456_v47  ;;  %v634_v9 = vrot.slane %v2456_v47, 1  ;;  %v2498_v10 = vmul.f32 %v1683_v56, %v2456_v47  ;;  %v1653_v48 = vld [vmem:[%s3097_s2 + $0xc8] sm:$0xff]  ;;  %v1654_v49 = vld [vmem:[%s3097_s2 + $0xd0] sm:$0xff]  ;;  %v1652_v47 = vld [vmem:[%s3097_s2 + $0xc0] sm:$0xff] }
 0x1d3   : > { %v542_v51 = vmax.f32 %v514_v45, 0.0  ;;  %v569_v61 = vrot.slane %v2464_v50, 7  ;;  %v637_v2 = vrot.slane %v2464_v50, 1  ;;  %v535_v20 = vadd.f32 %v1940_v52, %v2439_v32 }
 0x1d4   : > { %v526_v21 = vpop.f32.mrf.mxu1  ;;  %v561_v22 = vmul.f32 %v1631_v60, %v2464_v50  ;;  %v2516_v24 = vmul.f32 %v1640_v1, %v2464_v50  ;;  %v2538_v31 = vmul.f32 %v1678_v6, %v2464_v50  ;;  %v1660_v6 = vld [vmem:[%s3097_s2 + $0x140] sm:$0xff] }
 0x1d5   : > { %v567_v8 = vrot.slane %v542_v51, 7  ;;  %v635_v19 = vrot.slane %v542_v51, 1  ;;  %v581_v23 = vsel %vm576_vm1, %v568_v54, %v569_v61  ;;  %v647_v25 = vsel %vm642_vm2, %v636_v57, %v637_v2 }
 0x1d6   : > { %v2540_v33 = vmul.f32 %v1629_v7, %v542_v51  ;;  %v663_v44 = vmul.f32 %v1647_v15, %v647_v25  ;;  %v688_v45 = vmul.f32 %v1655_v26, %v581_v23  ;;  %v620_v46 = vmul.f32 %v1638_v27, %v542_v51  ;;  %v1661_v7 = vld [vmem:[%s3097_s2 + $0x148] sm:$0xff]  ;;  %v1634_v27 = vld [vmem:[%s3097_s2 + $0x130] sm:$0xff] }
 0x1d7   : > { %v582_v34 = vsel %vm576_vm1, %v567_v8, %v568_v54  ;;  %v583_v35 = vsel %vm576_vm1, %v566_v4, %v567_v8  ;;  %v648_v40 = vsel %vm642_vm2, %v635_v19, %v636_v57  ;;  %v2557_v41 = vsel %vm642_vm2, %v634_v9, %v635_v19  ;;  %v1941_v54 = vpop.f32.mrf.mxu1  ;;  %v1668_v8 = vld [vmem:[%s3097_s2 + $0x180] sm:$0xff] }
 0x1d8   : > { %v595_v37 = vmul.f32 %v587_v16, %v583_v35  ;;  %v596_v38 = vmul.f32 %v588_v17, %v582_v34  ;;  %v2571_v52 = vmul.f32 %v1676_v28, %v542_v51  ;;  %v712_v56 = vmul.f32 %v1662_v29, %v647_v25 }
 0x1d9   : > { %v737_v57 = vmul.f32 %v1670_v30, %v581_v23  ;;  %v2582_v15 = vmul.f32 %v1685_v36, %v647_v25  ;;  %v2585_v51 = vmul.f32 %v1645_v42, %v2557_v41  ;;  %v662_v16 = vmul.f32 %v1646_v43, %v648_v40  ;;  %v1684_v25 = vld [vmem:[%s3097_s2 + $0x200] sm:$0xff] }
 0x1da   : > { %v603_v60 = vadd.f32 %v595_v37, %v560_v53  ;;  %v604_v1 = vadd.f32 %v596_v38, %v561_v22  ;;  %v1669_v53 = vld [vmem:[%s3097_s2 + $0x188] sm:$0xff]  ;;  %v2590_v17 = vmax.f32 %v535_v20, 0.0  ;;  %v2593_v26 = vmul.f32 %v1653_v48, %v583_v35  ;;  %v589_v20 = vld [vmem:[%s3097_s2 + $0x20] sm:$0xff]  ;;  %v529_v38 = vpop.f32.mrf.mxu1 }
 0x1db   : > { %v527_v28 = vadd.f32 %v2439_v32, %v526_v21  ;;  %v687_v29 = vmul.f32 %v1654_v49, %v582_v34  ;;  %v2606_v30 = vmul.f32 %v1660_v6, %v2557_v41  ;;  %v2610_v36 = vmul.f32 %v1668_v8, %v583_v35  ;;  %v1632_v37 = vld [vmem:[%s3097_s2 + $0x120] sm:$0xff]  ;;  %v1643_v21 = vld [vmem:[%s3097_s2 + $0x78] sm:$0xff] }
 0x1dc   : > { %v628_v19 = vadd.f32 %v620_v46, %v603_v60  ;;  %v629_v22 = vadd.f32 %v2467_v55, %v604_v1  ;;  %v2608_v55 = vmul.f32 %v1661_v7, %v648_v40  ;;  %v2615_v43 = vmul.f32 %v1669_v53, %v582_v34  ;;  %v1681_v34 = vld [vmem:[%s3097_s2 + $0x1e8] sm:$0xff]  ;;  %v1663_v53 = vld [vmem:[%s3097_s2 + $0x158] sm:$0xff] }
 0x1dd   : > { %v2620_v46 = vmax.f32 %v527_v28, 0.0  ;;  %v2622_v49 = vmul.f32 %v1684_v25, %v648_v40  ;;  %v2625_v35 = vmul.f32 %v1634_v27, %v2590_v17  ;;  %v597_v60 = vmul.f32 %v589_v20, %v581_v23  ;;  %v1641_v40 = vld [vmem:[%s3097_s2 + $0x68] sm:$0xff]  ;;  %v1648_v28 = vld [vmem:[%s3097_s2 + $0xa0] sm:$0xff] }
 0x1de   : > { %v670_v42 = vadd.f32 %v662_v16, %v628_v19  ;;  %v671_v48 = vadd.f32 %v663_v44, %v629_v22  ;;  %v538_v1 = vadd.f32 %v1941_v54, %v2439_v32  ;;  %v530_v44 = vadd.f32 %v2439_v32, %v529_v38  ;;  %v1679_v19 = vld [vmem:[%s3097_s2 + $0x1d8] sm:$0xff] }
 0x1df   : > { %v562_v7 = vmul.f32 %v1632_v37, %v2620_v46  ;;  %v3104_v8 = vrot.slane %v2620_v46, 7  ;;  %v572_v16 = vrot.slane %v2590_v17, 7  ;;  %v2639_v23 = vmul.f32 %v1643_v21, %v2590_v17  ;;  %v1671_v38 = vld [vmem:[%s3097_s2 + $0x198] sm:$0xff] }
 0x1e0   : > { %v695_v6 = vadd.f32 %v687_v29, %v670_v42  ;;  %v3102_v54 = vrot.slane %v2620_v46, 1  ;;  %v2648_v22 = vmax.f32 %v538_v1, 0.0  ;;  %v3103_v32 = vrot.slane %v2590_v17, 1  ;;  %v1686_v42 = vld [vmem:[%s3097_s2 + $0x210] sm:$0xff] }
 0x1e1   : > { %v605_v27 = vadd.f32 %v597_v60, %v562_v7  ;;  %v696_v20 = vadd.f32 %v688_v45, %v671_v48  ;;  %v2655_v29 = vmul.f32 %v1681_v34, %v2590_v17  ;;  %v580_v37 = vsel %vm576_vm1, %v569_v61, %v3104_v8  ;;  %v585_v34 = vld [vmem:[%s3097_s2] sm:$0xff] }
 0x1e2   : > { %v720_v25 = vadd.f32 %v712_v56, %v695_v6  ;;  %v2664_v56 = vmul.f32 %v1641_v40, %v2620_v46  ;;  %v646_v45 = vsel %vm642_vm2, %v637_v2, %v3102_v54  ;;  %v763_v48 = vmul.f32 %v1679_v19, %v2620_v46  ;;  %v1656_v2 = vld [vmem:[%s3097_s2 + $0xe0] sm:$0xff]  ;;  %v1635_v19 = vld [vmem:[%s3097_s2 + $0x138] sm:$0xff] }
 0x1e3   : > { %v713_v61 = vmul.f32 %v1663_v53, %v646_v45  ;;  %v2679_v60 = vmax.f32 %v530_v44, 0.0  ;;  %v630_v1 = vadd.f32 %v2516_v24, %v605_v27  ;;  %v664_v50 = vmul.f32 %v1648_v28, %v646_v45 }
 0x1e4   : > { %v745_v21 = vadd.f32 %v737_v57, %v720_v25  ;;  %v573_v6 = vrot.slane %v2648_v22, 7  ;;  %v586_v57 = vld [vmem:[%s3097_s2 + $0x8] sm:$0xff]  ;;  %v641_v7 = vrot.slane %v2648_v22, 1  ;;  %v738_v44 = vmul.f32 %v1671_v38, %v580_v37  ;;  %v1636_v25 = vld [vmem:[%s3097_s2 + $0x40] sm:$0xff] }
 0x1e5   : > { %v721_v40 = vadd.f32 %v713_v61, %v696_v20  ;;  %v787_v53 = vmul.f32 %v1686_v42, %v646_v45  ;;  %v1644_v45 = vld [vmem:[%s3097_s2 + $0x80] sm:$0xff]  ;;  %v689_v38 = vmul.f32 %v1656_v2, %v580_v37  ;;  %v565_v2 = vmul.f32 %v1635_v19, %v2648_v22  ;;  %v590_v19 = vld [vmem:[%s3097_s2 + $0x28] sm:$0xff] }
 0x1e6   : > { %v770_v24 = vadd.f32 %v2538_v31, %v745_v21  ;;  %v577_v27 = vsel %vm576_vm1, %v572_v16, %v573_v6  ;;  %v584_v28 = vsel %vm576_vm1, %v573_v6, %v566_v4  ;;  %v2712_v31 = vsel %vm642_vm2, %v3103_v32, %v641_v7  ;;  %v1651_v4 = vld [vmem:[%s3097_s2 + $0xb8] sm:$0xff]  ;;  %v1666_v6 = vld [vmem:[%s3097_s2 + $0x170] sm:$0xff] }
 0x1e7   : > { %v2718_v20 = vsel %vm642_vm2, %v641_v7, %v634_v9  ;;  %v746_v42 = vadd.f32 %v738_v44, %v721_v40  ;;  %v593_v21 = vmul.f32 %v585_v34, %v577_v27  ;;  %v594_v61 = vmul.f32 %v586_v57, %v584_v28  ;;  %v1659_v9 = vld [vmem:[%s3097_s2 + $0xf8] sm:$0xff]  ;;  %v1674_v40 = vld [vmem:[%s3097_s2 + $0x1b0] sm:$0xff] }
 0x1e8   : > { %v672_v7 = vadd.f32 %v664_v50, %v630_v1  ;;  %v2735_v18 = vadd.f32 %v787_v53, %v770_v24  ;;  %v618_v34 = vmul.f32 %v1636_v25, %v2648_v22  ;;  %v1667_v57 = vld [vmem:[%s3097_s2 + $0x178] sm:$0xff]  ;;  %v660_v1 = vmul.f32 %v1644_v45, %v2718_v20  ;;  %v1633_v53 = vld [vmem:[%s3097_s2 + $0x128] sm:$0xff] }
 0x1e9   : > { %v601_v44 = vadd.f32 %v593_v21, %v2484_v3  ;;  %v602_v54 = vadd.f32 %v594_v61, %v2540_v33  ;;  %v2749_v50 = vmul.f32 %v1651_v4, %v2712_v31  ;;  %v1675_v24 = vld [vmem:[%s3097_s2 + $0x1b8] sm:$0xff]  ;;  %v2760_v3 = vadd.f32 %v763_v48, %v746_v42  ;;  %v1642_v4 = vld [vmem:[%s3097_s2 + $0x70] sm:$0xff] }
 0x1ea   : > { %v685_v33 = vmul.f32 %v1652_v47, %v584_v28  ;;  %v2762_v25 = vmul.f32 %v1659_v9, %v577_v27  ;;  %v2765_v45 = vmul.f32 %v1666_v6, %v2712_v31  ;;  %v2772_v32 = vmul.f32 %v1667_v57, %v2718_v20  ;;  %v591_v9 = vld [vmem:[%s3097_s2 + $0x30] sm:$0xff]  ;;  %v592_v6 = vld [vmem:[%s3097_s2 + $0x38] sm:$0xff]  ;;  %v1657_v57 = vld [vmem:[%s3097_s2 + $0xe8] sm:$0xff] }
 0x1eb   : > { %v626_v21 = vadd.f32 %v618_v34, %v601_v44  ;;  %v627_v61 = vadd.f32 %v2488_v5, %v602_v54  ;;  %v2774_v8 = vmul.f32 %v1674_v40, %v577_v27  ;;  %v2776_v48 = vmul.f32 %v1675_v24, %v584_v28 }
 0x1ec   : > { %v563_v42 = vmul.f32 %v1633_v53, %v2679_v60  ;;  %v571_v47 = vrot.slane %v2679_v60, 7  ;;  %v598_v5 = vmul.f32 %v590_v19, %v580_v37  ;;  %v624_v27 = vmul.f32 %v1642_v4, %v2679_v60 }
 0x1ed   : > { %v668_v54 = vadd.f32 %v660_v1, %v626_v21  ;;  %v669_v34 = vadd.f32 %v2585_v51, %v627_v61  ;;  %v639_v28 = vrot.slane %v2679_v60, 1  ;;  %v3107_v44 = vrot.slane %v2620_v46, 7  ;;  %v1649_v51 = vld [vmem:[%s3097_s2 + $0xa8] sm:$0xff]  ;;  %v1658_v61 = vld [vmem:[%s3097_s2 + $0xf0] sm:$0xff] }
 0x1ee   : > { %v578_v40 = vsel %vm576_vm1, %v571_v47, %v572_v16  ;;  %v606_v1 = vadd.f32 %v598_v5, %v563_v42  ;;  %v697_v24 = vadd.f32 %v689_v38, %v672_v7  ;;  %v1650_v16 = vld [vmem:[%s3097_s2 + $0xb0] sm:$0xff]  ;;  %v1664_v42 = vld [vmem:[%s3097_s2 + $0x160] sm:$0xff]  ;;  %v3108_v38 = vrot.slane %v2590_v17, 1  ;;  %v1665_v17 = vld [vmem:[%s3097_s2 + $0x168] sm:$0xff] }
 0x1ef   : > { %v579_v37 = vsel %vm576_vm1, %v3107_v44, %v571_v47  ;;  %v693_v53 = vadd.f32 %v685_v33, %v668_v54  ;;  %v694_v19 = vadd.f32 %v2593_v26, %v669_v34  ;;  %v600_v21 = vmul.f32 %v592_v6, %v578_v40 }
 0x1f0   : > { %v599_v4 = vmul.f32 %v591_v9, %v579_v37  ;;  %v631_v47 = vadd.f32 %v2664_v56, %v606_v1  ;;  %v644_v26 = vsel %vm642_vm2, %v639_v28, %v3108_v38  ;;  %v3109_v7 = vrot.slane %v2620_v46, 1  ;;  %v1672_v56 = vld [vmem:[%s3097_s2 + $0x1a0] sm:$0xff] }
 0x1f1   : > { %v690_v9 = vmul.f32 %v1657_v57, %v579_v37  ;;  %v718_v6 = vadd.f32 %v2606_v30, %v693_v53  ;;  %v719_v5 = vadd.f32 %v2608_v55, %v694_v19  ;;  %v608_v34 = vadd.f32 %v600_v21, %v565_v2  ;;  %v1673_v2 = vld [vmem:[%s3097_s2 + $0x1a8] sm:$0xff]  ;;  %v1680_v53 = vld [vmem:[%s3097_s2 + $0x1e0] sm:$0xff] }
 0x1f2   : > { %v645_v33 = vsel %vm642_vm2, %v3109_v7, %v639_v28  ;;  %v607_v54 = vadd.f32 %v599_v4, %v2625_v35  ;;  %v666_v44 = vmul.f32 %v1650_v16, %v644_v26  ;;  %v691_v1 = vmul.f32 %v1658_v61, %v578_v40  ;;  %v1688_v61 = vld [vmem:[%s3097_s2 + $0x220] sm:$0xff] }
 0x1f3   : > { %v665_v46 = vmul.f32 %v1649_v51, %v645_v33  ;;  %v714_v28 = vmul.f32 %v1664_v42, %v645_v33  ;;  %v743_v57 = vadd.f32 %v2610_v36, %v718_v6  ;;  %v744_v30 = vadd.f32 %v2615_v43, %v719_v5  ;;  %v1687_v36 = vld [vmem:[%s3097_s2 + $0x218] sm:$0xff] }
 0x1f4   : > { %v632_v55 = vadd.f32 %v624_v27, %v607_v54  ;;  %v633_v35 = vadd.f32 %v2639_v23, %v608_v34  ;;  %v715_v51 = vmul.f32 %v1665_v17, %v644_v26  ;;  %v739_v21 = vmul.f32 %v1672_v56, %v579_v37  ;;  %v1691_v17 = vld [vmem:[%s3097_s2 + $0x238] sm:$0xff] }
 0x1f5   : > { %v673_v19 = vadd.f32 %v665_v46, %v631_v47  ;;  %v722_v4 = vadd.f32 %v714_v28, %v697_v24  ;;  %v768_v43 = vadd.f32 %v2571_v52, %v743_v57  ;;  %v769_v23 = vadd.f32 %v2473_v59, %v744_v30  ;;  %v1692_v24 = vld [vmem:[%s3098_s3 + $0x2] ss:$0 sm:$0xff] }
 0x1f6   : > { %v674_v27 = vadd.f32 %v666_v44, %v632_v55  ;;  %v675_v16 = vadd.f32 %v2749_v50, %v633_v35  ;;  %v740_v47 = vmul.f32 %v1673_v2, %v578_v40  ;;  %v764_v37 = vmul.f32 %v1680_v53, %v2679_v60  ;;  %v1682_v50 = vld [vmem:[%s3097_s2 + $0x1f0] sm:$0xff]  ;;  %v1689_v60 = vld [vmem:[%s3097_s2 + $0x228] sm:$0xff] }
 0x1f7   : > { %v698_v42 = vadd.f32 %v690_v9, %v673_v19  ;;  %v747_v38 = vadd.f32 %v739_v21, %v722_v4  ;;  %v793_v52 = vadd.f32 %v2622_v49, %v768_v43  ;;  %v788_v6 = vmul.f32 %v1687_v36, %v645_v33 }
 0x1f8   : > { %v699_v7 = vadd.f32 %v691_v1, %v674_v27  ;;  %v700_v59 = vadd.f32 %v2762_v25, %v675_v16  ;;  %v789_v40 = vmul.f32 %v1688_v61, %v644_v26  ;;  %v794_v54 = vadd.f32 %v2582_v15, %v769_v23  ;;  %v1690_v15 = vld [vmem:[%s3097_s2 + $0x230] sm:$0xff] }
 0x1f9   : > { %v723_v5 = vadd.f32 %v715_v51, %v698_v42  ;;  %v772_v9 = vadd.f32 %v764_v37, %v747_v38  ;;  %v2862_v34 = vadd.f32 %v1692_v24, %v793_v52  ;;  %v796_v25 = vadd.f32 %v788_v6, %v2760_v3 }
 0x1fa   : > { %v724_v49 = vadd.f32 %v2765_v45, %v699_v7  ;;  %v725_v33 = vadd.f32 %v2772_v32, %v700_v59  ;;  %v2871_v26 = vadd.f32 %v1692_v24, %v2735_v18  ;;  %v2876_v44 = vadd.f32 %v1692_v24, %v794_v54  ;;  %v2128_v54 = vld [vmem:[%s3096_s1 + $0x130] sm:$0xff]  }
 0x1fb   : > { %v748_v56 = vadd.f32 %v740_v47, %v723_v5  ;;  %v797_v46 = vadd.f32 %v789_v40, %v772_v9  ;;  %v766_v45 = vmul.f32 %v1682_v50, %v2648_v22  ;;  %v814_v32 = vmax.f32 %v2862_v34, 0.0  ;;  %v2125_v5 = vld [vmem:[%s3096_s1 + $0xc8] sm:$0xff]   ;;  %v2126_v9 = vld [vmem:[%s3096_s1 + $0xc0] sm:$0xff]   ;;  %v2127_v40 = vld [vmem:[%s3096_s1 + $0x138] sm:$0xff]  }
 0x1fc   : > { %v749_v3 = vadd.f32 %v2774_v8, %v724_v49  ;;  %v750_v1 = vadd.f32 %v2776_v48, %v725_v33  ;;  %v790_v28 = vmul.f32 %v1689_v60, %v2712_v31  ;;  %v2884_v57 = vadd.f32 %v1692_v24, %v796_v25  ;;  %1975 = vmatpush3.bf16.msra.mxu1 %v2125_v5  ;;  %v2129_v49 = vld [vmem:[%s3096_s1 + $0x128] sm:$0xff]   ;;  %v2130_v25 = vld [vmem:[%s3096_s1 + $0x120] sm:$0xff]  }
 0x1fd   : > { %v773_v18 = vadd.f32 %v2655_v29, %v748_v56  ;;  %v815_v30 = vmax.f32 %v2876_v44, 0.0  ;;  %v792_v55 = vmul.f32 %v1691_v17, %v2557_v41  ;;  %v791_v35 = vmul.f32 %v1690_v15, %v2718_v20  ;;  %1982 = vmatprep.subr.bf16.mxu0 %v2127_v40  ;;  %v855_v33 = vld [vmem:[%s3098_s3 + $0x3] sm:$0x1] }
 0x1fe   : > { %v774_v2 = vadd.f32 %v766_v45, %v749_v3  ;;  %v775_v22 = vadd.f32 %v2498_v10, %v750_v1  ;;  %v816_v8 = vmax.f32 %v2871_v26, 0.0  ;;  %v2891_v19 = vadd.f32 %v1692_v24, %v797_v46 }
 0x1ff   : > { %v798_v53 = vadd.f32 %v790_v28, %v773_v18  ;;  %v822_v29 = vadd.f32 %v815_v30, %v814_v32  ;;  %v817_v48 = vmax.f32 %v2884_v57, 0.0  ;;  %v3110_v60 = vmov 0.0   ;;  %v2131_v28 = vld [vmem:[%s3096_s1 + $0x118] sm:$0xff]   ;;  %v2132_v18 = vld [vmem:[%s3096_s1 + $0x110] sm:$0xff]  }
 0x200   : > { %v799_v31 = vadd.f32 %v791_v35, %v774_v2  ;;  %v800_v20 = vadd.f32 %v792_v55, %v775_v22  ;;  %v818_v10 = vmax.f32 %v2891_v19, 0.0  ;;  %1976 = vmatprep.subr.bf16.mxu1 %v3110_v60  ;;  %v2133_v55 = vld [vmem:[%s3096_s1 + $0x108] sm:$0xff]   ;;  %v2134_v35 = vld [vmem:[%s3096_s1 + $0x100] sm:$0xff]   ;;  %v2135_v2 = vld [vmem:[%s3096_s1 + $0x178] sm:$0xff]  }
 0x201   : > { %v823_v41 = vadd.f32 %v822_v29, %v816_v8  ;;  %v2900_v51 = vadd.f32 %v1692_v24, %v798_v53  ;;  %1977 = vmatpush3.bf16.msra.mxu1 %v2126_v9  ;;  %v2136_v22 = vld [vmem:[%s3096_s1 + $0x170] sm:$0xff]   ;;  %v2137_v53 = vld [vmem:[%s3096_s1 + $0x168] sm:$0xff]   ;;  %v2138_v29 = vld [vmem:[%s3096_s1 + $0x160] sm:$0xff]  }
 0x202   : > { %v2905_v21 = vadd.f32 %v1692_v24, %v799_v31  ;;  %v2909_v43 = vadd.f32 %v1692_v24, %v800_v20  ;;  %2006 = vmatprep.subr.bf16.mxu1 %v2135_v2  ;;  %v2139_v31 = vld [vmem:[%s3096_s1 + $0x158] sm:$0xff]   ;;  %v2140_v57 = vld [vmem:[%s3096_s1 + $0x150] sm:$0xff]  }
 0x203   : > { %v824_v4 = vadd.f32 %v823_v41, %v817_v48  ;;  %v819_v23 = vmax.f32 %v2900_v51, 0.0  ;;  %v963_v41 = vld [vmem:[%s3098_s3 + $0x4] sm:$0x1]  ;;  %v1757_v51 = vld [vmem:[%s3098_s3 + $0x5] ss:$0 sm:$0xff] }
 0x204   : > { %v820_v27 = vmax.f32 %v2905_v21, 0.0  ;;  %v821_v61 = vmax.f32 %v2909_v43, 0.0 }
 0x205   : > { %v825_v36 = vadd.f32 %v824_v4, %v818_v10 }
 0x207   : > { %v826_v16 = vadd.f32 %v825_v36, %v819_v23 }
 0x209   : > { %v827_v42 = vadd.f32 %v826_v16, %v820_v27 }
 0x20b   : > { %v828_v47 = vadd.f32 %v827_v42, %v821_v61 }
 0x20d   : > { %v829_v38 = vrot.slane %v828_v47, 4 }
 0x20f   : > { %v830_v37 = vadd.f32 %v829_v38, %v828_v47 }
 0x211   : > { %v831_v52 = vrot.slane %v830_v37, 2 }
 0x213   : > { %v832_v24 = vadd.f32 %v831_v52, %v830_v37  ;;  %v1058_v52 = vsub.s32 0, %v2443_v39 }
 0x215   : > { %v833_v7 = vrot.slane %v832_v24, 1 }
 0x217   : > { %v834_v59 = vadd.f32 %v833_v7, %v832_v24 }
 0x219   : > { %v836_v6 = vmul.f32 0.015625, %v834_v59 }
 0x21b   : > { %v837_v50 = vpack.c.bf16 %v836_v6, %v836_v6 }
 0x21d   : > { %1959 = vmatmul.mubr.bf16.vlgmr.msra.gmra.mxu0 %v837_v50 }
 0x21e   : > { %1983 = vmatpush3.bf16.msra.mxu0 %v2127_v40 }
 0x21f   : > { %1984 = vmatprep.subr.bf16.mxu0 %v2128_v54 }
 0x222   : > { %1985 = vmatpush3.bf16.msra.mxu0 %v2128_v54 }
 0x223   : > { %1986 = vmatprep.subr.bf16.mxu0 %v2129_v49 }
 0x226   : > { %1987 = vmatpush3.bf16.msra.mxu0 %v2129_v49 }
 0x227   : > { %1988 = vmatprep.subr.bf16.mxu0 %v2130_v25 }
 0x22a   : > { %1989 = vmatpush3.bf16.msra.mxu0 %v2130_v25 }
 0x22b   : > { %1990 = vmatprep.subr.bf16.mxu0 %v2131_v28 }
 0x22e   : > { %1991 = vmatpush3.bf16.msra.mxu0 %v2131_v28 }
 0x22f   : > { %1992 = vmatprep.subr.bf16.mxu0 %v2132_v18 }
 0x232   : > { %1993 = vmatpush3.bf16.msra.mxu0 %v2132_v18 }
 0x233   : > { %1994 = vmatprep.subr.bf16.mxu0 %v2133_v55 }
 0x236   : > { %1995 = vmatpush3.bf16.msra.mxu0 %v2133_v55 }
 0x237   : > { %1996 = vmatprep.subr.bf16.mxu0 %v2134_v35 }
 0x23a   : > { %1997 = vmatpush3.bf16.msra.mxu0 %v2134_v35 }
 0x23b   : > { %2030 = vmatprep.subr.bf16.mxu0 %v3110_v60 }
 0x2dd   : > { %v938_v17 = vpop.f32.mrf.mxu0 }
 0x2de   : > { %v939_v15 = vadd.f32 %v938_v17, %v855_v33 }
 0x2df   : > { %v1960_v56 = vpop.f32.mrf.mxu0 }
 0x2e0   : > { %v944_v46 = vmax.f32 %v939_v15, 0.0 }
 0x2e1   : > { %v941_v45 = vpop.f32.mrf.mxu0 }
 0x2e2   : > { %v945_v3 = vpack.c.bf16 %v944_v46, %v944_v46 }
 0x2e3   : > { %v1961_v1 = vpop.f32.mrf.mxu0 }
 0x2e4   : > { %1979 = vmatmul.mubr.bf16.vlgmr.msra.gmra.mxu1 %v945_v3 }
 0x2e5   : > { %2007 = vmatpush3.bf16.msra.mxu1 %v2135_v2 }
 0x2e6   : > { %2008 = vmatprep.subr.bf16.mxu1 %v2136_v22 }
 0x2e9   : > { %2009 = vmatpush3.bf16.msra.mxu1 %v2136_v22 }
 0x2ea   : > { %2010 = vmatprep.subr.bf16.mxu1 %v2137_v53 }
 0x2ed   : > { %2011 = vmatpush3.bf16.msra.mxu1 %v2137_v53  ;;  %v2143_v53 = vld [vmem:[%s3096_s1 + $0x1b8] sm:$0xff]  }
 0x2ee   : > { %2012 = vmatprep.subr.bf16.mxu1 %v2138_v29 }
 0x2f1   : > { %2013 = vmatpush3.bf16.msra.mxu1 %v2138_v29  ;;  %v2148_v29 = vld [vmem:[%s3096_s1 + $0x190] sm:$0xff]  }
 0x2f2   : > { %2014 = vmatprep.subr.bf16.mxu1 %v2139_v31 }
 0x2f5   : > { %2015 = vmatpush3.bf16.msra.mxu1 %v2139_v31  ;;  %v2149_v31 = vld [vmem:[%s3096_s1 + $0x188] sm:$0xff]  }
 0x2f6   : > { %2016 = vmatprep.subr.bf16.mxu1 %v2140_v57 }
 0x2f9   : > { %2017 = vmatpush3.bf16.msra.mxu1 %v2140_v57 }
 0x3a4   : > { %v1046_v20 = vpop.f32.mrf.mxu1 }
 0x3a5   : > { %v1047_v4 = vadd.f32 %v1046_v20, %v963_v41  ;;  %v2150_v41 = vld [vmem:[%s3096_s1 + $0x180] sm:$0xff]  }
 0x3a6   : > { %v1980_v36 = vpop.f32.mrf.mxu1  ;;  %v1782_v20 = vld [vmem:[%s3098_s3 + $0x6] ss:$0 sm:$0xff] }
 0x3a7   : > { %v1052_v16 = vadd.f32 3.0, %v1047_v4 }
 0x3a8   : > { %v1049_v42 = vpop.f32.mrf.mxu1 }
 0x3a9   : > { %v1053_v47 = vmax.f32 %v1052_v16, 0.0 }
 0x3aa   : > { %v1981_v38 = vpop.f32.mrf.mxu1 }
 0x3ab   : > { %v1054_v37 = vmin.f32 %v1053_v47, 6.0 }
 0x3ad   : > { %v1055_v24 = vmul.f32 0.16666667, %v1054_v37 }
 0x3af   : > { %v1059_v7 = vrot.slane %v1055_v24, %v1058_v52 }
 0x3b1   : > { %v1060_v59 = vmul.f32 %v1059_v7, %v814_v32  ;;  %v1061_v6 = vmul.f32 %v1059_v7, %v815_v30  ;;  %v1062_v50 = vmul.f32 %v1059_v7, %v816_v8  ;;  %v1063_v5 = vmul.f32 %v1059_v7, %v817_v48  ;;  %v2141_v30 = vld [vmem:[%s3096_s1 + $0x148] sm:$0xff]   ;;  %v2142_v8 = vld [vmem:[%s3096_s1 + $0x140] sm:$0xff]  }
 0x3b2   : > { %v1064_v9 = vmul.f32 %v1059_v7, %v818_v10  ;;  %v1065_v39 = vmul.f32 %v1059_v7, %v819_v23  ;;  %v1066_v44 = vmul.f32 %v1059_v7, %v820_v27  ;;  %v1067_v26 = vmul.f32 %v1059_v7, %v821_v61  ;;  %2018 = vmatprep.subr.bf16.mxu1 %v2141_v30 }
 0x3b3   : > { %v1068_v40 = vpack.c.bf16 %v1061_v6, %v1060_v59  ;;  %v1069_v54 = vpack.c.bf16 %v1063_v5, %v1062_v50  ;;  %2019 = vmatpush3.bf16.msra.mxu1 %v2141_v30 }
 0x3b4   : > { %v1070_v34 = vpack.c.bf16 %v1065_v39, %v1064_v9  ;;  %v1071_v32 = vpack.c.bf16 %v1067_v26, %v1066_v44  ;;  %2020 = vmatprep.subr.bf16.mxu1 %v2142_v8 }
 0x3b5   : > { %1998 = vmatprep.mubr.bf16.mxu0 %v1068_v40 }
 0x3b6   : > { %1999 = vmatmul.mubr.bf16.vlgmr.msra.gmra.mxu0 %v1069_v54 }
 0x3b7   : > { %2002 = vmatprep.mubr.bf16.mxu0 %v1070_v34  ;;  %2021 = vmatpush3.bf16.msra.mxu1 %v2142_v8 }
 0x3b8   : > { %2031 = vmatpush3.bf16.msra.mxu0 %v2143_v53 }
 0x3b9   : > { %2032 = vmatprep.subr.bf16.mxu0 %v3110_v60 }
 0x3be   : > { %2003 = vmatmul.mubr.bf16.gmra.mxu0 %v1071_v32 }
 0x3bf   : > { %2046 = vmatprep.mubr.msk.bf16.mxu0 %vm2214_vm0, %v3110_v60 }
 0x476   : > { %v2000_v19 = vpop.f32.mrf.mxu0 }
 0x477   : > { %v1185_v23 = vadd.f32 %v2000_v19, %v1757_v51 }
 0x478   : > { %v1176_v48 = vpop.f32.mrf.mxu0 }
 0x479   : > { %v1177_v21 = vadd.f32 %v1757_v51, %v1176_v48  ;;  %v1209_v15 = vadd.f32 %v1185_v23, %v2357_v0 }
 0x47a   : > { %v2001_v10 = vpop.f32.mrf.mxu0 }
 0x47b   : > { %v1188_v43 = vadd.f32 %v2001_v10, %v1757_v51  ;;  %v1207_v33 = vadd.f32 %v1177_v21, %v2353_v62 }
 0x47c   : > { %v1179_v27 = vpop.f32.mrf.mxu0 }
 0x47d   : > { %v1180_v61 = vadd.f32 %v1757_v51, %v1179_v27  ;;  %v1210_v49 = vadd.f32 %v1188_v43, %v2351_v58 }
 0x47e   : > { %v2004_v25 = vpop.f32.mrf.mxu0 }
 0x47f   : > { %v1208_v17 = vadd.f32 %v1180_v61, %v2355_v63  ;;  %v1216_v45 = vpack.c.bf16 %v1210_v49, %v1209_v15  ;;  %v1201_v18 = vadd.f32 %v2004_v25, %v1757_v51 }
 0x480   : > { %v1192_v56 = vpop.f32.mrf.mxu0 }
 0x481   : > { %v1215_v46 = vpack.c.bf16 %v1208_v17, %v1207_v33  ;;  %v1193_v1 = vadd.f32 %v1757_v51, %v1192_v56  ;;  %v1213_v63 = vadd.f32 %v1201_v18, %v2369_v14  ;;  %v2147_v14 = vld [vmem:[%s3096_s1 + $0x198] sm:$0xff]  }
 0x482   : > { %v2005_v3 = vpop.f32.mrf.mxu0 }
 0x483   : > { %v1204_v28 = vadd.f32 %v2005_v3, %v1757_v51  ;;  %2022 = vmatprep.mubr.bf16.mxu1 %v1215_v46  ;;  %v1211_v2 = vadd.f32 %v1193_v1, %v2363_v11  ;;  %v2145_v11 = vld [vmem:[%s3096_s1 + $0x1a8] sm:$0xff]  }
 0x484   : > { %v1195_v55 = vpop.f32.mrf.mxu0  ;;  %2023 = vmatmul.mubr.bf16.vlgmr.msra.gmra.mxu1 %v1216_v45 }
 0x485   : > { %v1196_v35 = vadd.f32 %v1757_v51, %v1195_v55  ;;  %v1214_v58 = vadd.f32 %v1204_v28, %v2365_v12  ;;  %v2144_v12 = vld [vmem:[%s3096_s1 + $0x1b0] sm:$0xff]  }
 0x486   : > { %2033 = vmatpush3.bf16.msra.mxu0 %v2144_v12 }
 0x487   : > { %v1212_v62 = vadd.f32 %v1196_v35, %v2367_v13  ;;  %v1218_v22 = vpack.c.bf16 %v1214_v58, %v1213_v63  ;;  %2034 = vmatprep.subr.bf16.mxu0 %v3110_v60  ;;  %v2146_v13 = vld [vmem:[%s3096_s1 + $0x1a0] sm:$0xff]  }
 0x489   : > { %v1217_v0 = vpack.c.bf16 %v1212_v62, %v1211_v2 }
 0x48a   : > { %2035 = vmatpush3.bf16.msra.mxu0 %v2145_v11 }
 0x48b   : > { %2026 = vmatprep.mubr.bf16.mxu1 %v1217_v0  ;;  %2036 = vmatprep.subr.bf16.mxu0 %v3110_v60 }
 0x48c   : > { %2027 = vmatmul.mubr.bf16.gmra.mxu1 %v1218_v22 }
 0x48e   : > { %2037 = vmatpush3.bf16.msra.mxu0 %v2146_v13 }
 0x48f   : > { %2038 = vmatprep.subr.bf16.mxu0 %v3110_v60 }
 0x492   : > { %2039 = vmatpush3.bf16.msra.mxu0 %v2147_v14 }
 0x493   : > { %2040 = vmatprep.subr.bf16.mxu0 %v3110_v60 }
 0x496   : > { %2041 = vmatpush3.bf16.msra.mxu0 %v2148_v29 }
 0x497   : > { %2042 = vmatprep.subr.bf16.mxu0 %v3110_v60 }
 0x49a   : > { %2043 = vmatpush3.bf16.msra.mxu0 %v2149_v31 }
 0x49b   : > { %2044 = vmatprep.subr.bf16.mxu0 %v3110_v60 }
 0x49e   : > { %2045 = vmatpush3.bf16.msra.mxu0 %v2150_v41 }
 0x544   : > { %v2024_v4 = vpop.f32.mrf.mxu1 }
 0x545   : > { %v1332_v36 = vadd.f32 %v2024_v4, %v1782_v20 }
 0x546   : > { %v1323_v16 = vpop.f32.mrf.mxu1 }
 0x547   : > { %v1356_v42 = vadd.f32 3.0, %v1332_v36  ;;  %v1324_v47 = vadd.f32 %v1782_v20, %v1323_v16 }
 0x548   : > { %v2025_v38 = vpop.f32.mrf.mxu1 }
 0x549   : > { %v1354_v37 = vadd.f32 3.0, %v1324_v47  ;;  %v1335_v52 = vadd.f32 %v2025_v38, %v1782_v20  ;;  %v1364_v24 = vmax.f32 %v1356_v42, 0.0 }
 0x54a   : > { %v1326_v7 = vpop.f32.mrf.mxu1 }
 0x54b   : > { %v1362_v59 = vmax.f32 %v1354_v37, 0.0  ;;  %v1357_v6 = vadd.f32 3.0, %v1335_v52  ;;  %v1327_v50 = vadd.f32 %v1782_v20, %v1326_v7  ;;  %v1372_v40 = vmin.f32 %v1364_v24, 6.0 }
 0x54c   : > { %v2028_v5 = vpop.f32.mrf.mxu1 }
 0x54d   : > { %v1370_v60 = vmin.f32 %v1362_v59, 6.0  ;;  %v1365_v9 = vmax.f32 %v1357_v6, 0.0  ;;  %v1355_v39 = vadd.f32 3.0, %v1327_v50  ;;  %v1348_v54 = vadd.f32 %v2028_v5, %v1782_v20 }
 0x54e   : > { %v1339_v34 = vpop.f32.mrf.mxu1  ;;  %v1380_v51 = vmul.f32 %v1372_v40, %v1332_v36 }
 0x54f   : > { %v1363_v44 = vmax.f32 %v1355_v39, 0.0  ;;  %v1378_v26 = vmul.f32 %v1370_v60, %v1324_v47  ;;  %v1360_v32 = vadd.f32 3.0, %v1348_v54  ;;  %v1340_v57 = vadd.f32 %v1782_v20, %v1339_v34 }
 0x550   : > { %v2029_v30 = vpop.f32.mrf.mxu1  ;;  %v1373_v8 = vmin.f32 %v1365_v9, 6.0  ;;  %v1388_v45 = vmul.f32 0.16666667, %v1380_v51 }
 0x551   : > { %v1371_v19 = vmin.f32 %v1363_v44, 6.0  ;;  %v1351_v48 = vadd.f32 %v2029_v30, %v1782_v20  ;;  %v1358_v10 = vadd.f32 3.0, %v1340_v57  ;;  %v1368_v23 = vmax.f32 %v1360_v32, 0.0 }
 0x552   : > { %v1342_v21 = vpop.f32.mrf.mxu1  ;;  %v1386_v49 = vmul.f32 0.16666667, %v1378_v26  ;;  %v1381_v33 = vmul.f32 %v1373_v8, %v1335_v52  ;;  %v1426_v52 = vld [vmem:[%s3098_s3 + $0x7] sm:$0x1] }
 0x553   : > { %v1379_v43 = vmul.f32 %v1371_v19, %v1327_v50  ;;  %v1361_v27 = vadd.f32 3.0, %v1351_v48  ;;  %v1343_v61 = vadd.f32 %v1782_v20, %v1342_v21  ;;  %v1366_v25 = vmax.f32 %v1358_v10, 0.0 }
 0x554   : > { %v1376_v1 = vmin.f32 %v1368_v23, 6.0  ;;  %v1389_v55 = vmul.f32 0.16666667, %v1381_v33 }
 0x555   : > { %v1387_v17 = vmul.f32 0.16666667, %v1379_v43  ;;  %v1369_v15 = vmax.f32 %v1361_v27, 0.0  ;;  %v1359_v56 = vadd.f32 3.0, %v1343_v61  ;;  %v1374_v46 = vmin.f32 %v1366_v25, 6.0 }
 0x556   : > { %v1384_v62 = vmul.f32 %v1376_v1, %v1348_v54 }
 0x557   : > { %v1394_v3 = vadd.f32 %v1387_v17, %v1386_v49  ;;  %v1367_v28 = vmax.f32 %v1359_v56, 0.0  ;;  %v1382_v18 = vmul.f32 %v1374_v46, %v1340_v57  ;;  %v1377_v58 = vmin.f32 %v1369_v15, 6.0 }
 0x558   : > { %v1392_v13 = vmul.f32 0.16666667, %v1384_v62 }
 0x559   : > { %v1395_v35 = vadd.f32 %v1394_v3, %v1388_v45  ;;  %v1375_v2 = vmin.f32 %v1367_v28, 6.0  ;;  %v1390_v63 = vmul.f32 0.16666667, %v1382_v18  ;;  %v1385_v12 = vmul.f32 %v1377_v58, %v1351_v48 }
 0x55b   : > { %v1396_v0 = vadd.f32 %v1395_v35, %v1389_v55  ;;  %v1383_v22 = vmul.f32 %v1375_v2, %v1343_v61  ;;  %v1393_v29 = vmul.f32 0.16666667, %v1385_v12 }
 0x55d   : > { %v1397_v53 = vadd.f32 %v1396_v0, %v1390_v63  ;;  %v1391_v11 = vmul.f32 0.16666667, %v1383_v22 }
 0x55f   : > { %v1398_v14 = vadd.f32 %v1397_v53, %v1391_v11 }
 0x561   : > { %v1399_v31 = vadd.f32 %v1398_v14, %v1392_v13 }
 0x563   : > { %v1400_v41 = vadd.f32 %v1399_v31, %v1393_v29 }
 0x565   : > { %v1401_v20 = vrot.slane %v1400_v41, 4 }
 0x567   : > { %v1402_v4 = vadd.f32 %v1401_v20, %v1400_v41 }
 0x569   : > { %v1403_v36 = vrot.slane %v1402_v4, 2 }
 0x56b   : > { %v1404_v16 = vadd.f32 %v1403_v36, %v1402_v4 }
 0x56d   : > { %v1405_v42 = vrot.slane %v1404_v16, 1 }
 0x56f   : > { %v1406_v47 = vadd.f32 %v1405_v42, %v1404_v16 }
 0x571   : > { %v1407_v38 = vmul.f32 0.015625, %v1406_v47 }
 0x573   : > { %v1408_v37 = vpack.c.bf16 %v1407_v38, %v1407_v38 }
 0x575   : > { %2047 = vmatmul.mubr.bf16.vlgmr.msra.gmra.mxu0 %v1408_v37 }
 0x635   : > { %v1509_v24 = vpop.f32.mrf.mxu0 }
 0x636   : > { %v1510_v7 = vadd.f32 %v1509_v24, %v1426_v52 }
 0x637   : > { %v2048_v59 = vpop.f32.mrf.mxu0 }
 0x638   : > { %1515 = vst [vmem:[%s189_s8] sm:$0x1] %v1510_v7 }
 0x639   : > { %v1512_v6 = vpop.f32.mrf.mxu0 }
 0x63a   : > { %2164 = shalt.err (!%p2161_p3)
}
 0x63b   : > { %s2165_s11 = scalar_lea.hbm %s3054_s13, 16  ;;  %s2169_s29 = scalar_lea.hbm %s3099_s4, 32 }
 0x63c   : > { %p2166_p4 = scmp.ne.s32.totalorder %s3054_s13, %s2165_s11  ;;  %p2170_p9 = scmp.lt.s32.totalorder %s3054_s13, %s3099_s4 }
 0x63d   : > { %p2171_p10 = scmp.lt.s32.totalorder %s2169_s29, %s2165_s11 }
 0x63e   : > { %p2167_p7 = pnand %p2166_p4, %p2279_p5 }
 0x63f   : > { %p2172_p11 = por %p2171_p10, %p2170_p9 }
 0x640   : > { %p2168_p8 = pneg %p2167_p7 }
 0x642   : > { %p2173_p12 = pnand %p2172_p11, %p2168_p8 }
 0x644   : > { %2176 = shalt.err (!%p2173_p12)
}
 0x645   : > { %2050 = dma.vmem_to_hbm [thread:$0]  (%p2279_p5), %s3056_s9, 16, %s3054_s13, %s1517_s14   ;;  %v2049_v50 = vpop.f32.mrf.mxu0 }
 0x646 PF: > { %p2056_p13 = scmp.ge.s32.totalorder %s2211_s18, 2  ;;  %s1541_s6 = sand.u32 1, %s2199_s15  }
 0x647   : > { %s1542_s7 = scalar_lea.sflag [#allocation3], %s1541_s6 }
 0x648   : > { %p2053_p0 = pnand %p2056_p13, %p2283_p6 }
 0x64a   : > { %p2054_p1 = pneg %p2053_p0 }
 0x64c   : > { %2194 = dma.done.wait (%p2054_p1), %s1542_s7, 16  }
 0x64d   : > { %2196 = vsyncadd (%p2054_p1), %s1542_s7, 4294967280  ;;  %p14_p2 = scmp.ge.s32.totalorder %s2266_s21, 4   ;;  %s3111_s15 = smov %s2203_s16 }
 0x64e   : > { %s3112_s16 = smov %s2207_s17  ;;  %s3113_s17 = smov %s2277_s24 }
 0x64f   : > { %s3114_s18 = smov %s2266_s21  ;;  %16 = sbr.rel (!%p14_p2) target bundleno = 3 (0x3), region = 85 }
 0x654   :  { %1546 = vsyncpa [#allocation3], 1 }
 0x655   :  { %1548 = vsyncpa [#allocation3 + $0x1], 1 }

</bundles_post_ra>
